<compile_context>
chip_gen: v5e
topology: v5e:2x2
jax: 0.10.0
libtpu: 0.0.40
codegen_flags: <defaults>
</compile_context>

<pallas_src>
import functools

import numpy as np
import jax
import jax.numpy as jnp
from jax.experimental import pallas as pl
from jax.experimental.pallas import tpu as pltpu

_BN_EPS = 1e-5
# (dilation_h, dilation_w) of matrix11 / matrix12 / matrix21
_DILATIONS = ((1, 1), (2, 1), (1, 2))
_K = 3  # conv kernel size (fixed by the module)


def _round_up(x, m):
    return (x + m - 1) // m * m


def _matrix_kernel(x_ref, w_ref, b_ref, o_ref, *, W, Lpad, dilations):
    """One grid step = (image n, branch j): dilated 3x3 conv + BN(eval) + ReLU.

    x_ref : (1, C, Lin)       bf16  spatially flattened input, zero-padded tail
    w_ref : (1, 9, OC, C)     bf16  BN-scale-folded weight of branch j, tap-major
    b_ref : (1, OC, 1)        f32   folded BN bias of branch j
    o_ref : (1, 1, OC, Lpad)  f32   lane-dense (128-multiple) output slab
    """
    j = pl.program_id(1)
    xf = x_ref[0]                                     # (C, Lin) bf16
    bj = b_ref[0]                                     # (OC, 1)  f32

    def compute(dh, dw):
        acc = None
        for ky in range(_K):                          # static unroll over 9 taps
            for kx in range(_K):
                t = ky * _K + kx
                base = ky * dh * W + kx * dw          # static lane offset
                part = jnp.dot(w_ref[0, t], xf[:, base:base + Lpad],
                               preferred_element_type=jnp.float32)   # (OC, Lpad)
                acc = part if acc is None else acc + part
        # BN bias + ReLU, full-width unmasked store (Lpad is a multiple of 128).
        o_ref[0, 0] = jnp.maximum(acc + bj, 0.0)

    for bidx, (dh, dw) in enumerate(dilations):
        @pl.when(j == bidx)
        def _(dh=dh, dw=dw):
            compute(dh, dw)


def _fold_bn(weight, gamma, beta, mean, var):
    """Fold inference-mode BatchNorm into the conv weight / bias.

    Returns:
      w_tap: (9, OC, C) bf16, tap-major so the kernel indexes taps on a leading axis
             (no lane-dim slicing of the weight): w_tap[ky*3+kx, oc, c].
      bias : (OC, 1) f32
    """
    OC, C = weight.shape[0], weight.shape[1]
    scale = gamma / jnp.sqrt(var + _BN_EPS)
    bias = beta - mean * scale
    w = weight.astype(jnp.float32) * scale[:, None, None, None]      # (OC, C, 3, 3)
    w_tap = jnp.transpose(w, (2, 3, 0, 1)).reshape(_K * _K, OC, C)
    return w_tap.astype(jnp.bfloat16), bias.reshape(OC, 1).astype(jnp.float32)


def _matrix_branches(x_nchw, branch_params, dilations=_DILATIONS):
    """Apply the three conv+BN+ReLU branches of `matrix` to one input tensor.

    x_nchw        : (N, C, H, W)
    branch_params : list of 3 dicts {weight, gamma, beta, mean, var}, order = dilations
    Returns [y11, y12, y21] in NCHW.
    """
    N, C, H, W = x_nchw.shape
    OC = branch_params[0]["weight"].shape[0]
    nb = len(dilations)
    for p, (dh, dw) in zip(branch_params, dilations):
        assert p["weight"].shape == (OC, C, _K, _K), p["weight"].shape
        assert H > (_K - 1) * dh and W > (_K - 1) * dw, "input too small for dilation"

    # Lane-dense output width (covers the widest branch) and input length that covers
    # the worst-case tap read overhang -- derived from the dilations, not hard-coded.
    Lmax = max((H - (_K - 1) * dh) * W for dh, _ in dilations)
    Lpad = _round_up(Lmax, 128)
    max_base = max((_K - 1) * dh * W + (_K - 1) * dw for dh, dw in dilations)
    Lin = _round_up(max_base + Lpad, 128)

    # Wrapper-side layout plumbing only: flatten spatial, zero-pad the tail, cast bf16.
    xf = x_nchw.reshape(N, C, H * W).astype(jnp.float32)
    xf = jnp.pad(xf, ((0, 0), (0, 0), (0, Lin - H * W))).astype(jnp.bfloat16)

    folded = [_fold_bn(p["weight"], p["gamma"], p["beta"], p["mean"], p["var"])
              for p in branch_params]
    w_stack = jnp.stack([w for w, _ in folded])       # (3, 9, OC, C) bf16
    b_stack = jnp.stack([b for _, b in folded])       # (3, OC, 1)    f32

    out = pl.pallas_call(
        functools.partial(_matrix_kernel, W=W, Lpad=Lpad, dilations=dilations),
        out_shape=jax.ShapeDtypeStruct((N, nb, OC, Lpad), jnp.float32),
        grid=(N, nb),
        in_specs=[
            pl.BlockSpec((1, C, Lin), lambda n, j: (n, 0, 0)),
            pl.BlockSpec((1, _K * _K, OC, C), lambda n, j: (j, 0, 0, 0)),
            pl.BlockSpec((1, OC, 1), lambda n, j: (j, 0, 0)),
        ],
        out_specs=pl.BlockSpec((1, 1, OC, Lpad), lambda n, j: (n, j, 0, 0)),
        compiler_params=pltpu.CompilerParams(
            dimension_semantics=("parallel", "parallel")),
    )(xf, w_stack, b_stack)

    results = []
    for bidx, (dh, dw) in enumerate(dilations):
        OH, OW = H - (_K - 1) * dh, W - (_K - 1) * dw
        # crop the lane padding and the kx wrap-around columns (pure layout plumbing)
        o = out[:, bidx, :, :OH * W].reshape(N, OC, OH, W)[:, :, :, :OW]
        results.append(o)
    return results


def matrix_forward(z, x, params_k, params_s):
    """Pallas equivalent of matrix.forward(z, x) (BatchNorm in inference mode)."""
    return _matrix_branches(z, params_k), _matrix_branches(x, params_s)


# ----------------------------- reference & test -----------------------------
def _ref_branch(x, weight, gamma, beta, mean, var, dh, dw):
    """NumPy f64 reference: valid dilated 3x3 conv (no bias) + BN(eval) + ReLU."""
    x = np.asarray(x, np.float64)
    w = np.asarray(weight, np.float64)
    N, C, H, W = x.shape
    OC = w.shape[0]
    OH, OW = H - 2 * dh, W - 2 * dw
    out = np.zeros((N, OC, OH, OW))
    for ky in range(3):
        for kx in range(3):
            patch = x[:, :, ky * dh:ky * dh + OH, kx * dw:kx * dw + OW]
            out += np.einsum("nchw,oc->nohw", patch, w[:, :, ky, kx])
    scale = np.asarray(gamma, np.float64) / np.sqrt(np.asarray(var, np.float64) + _BN_EPS)
    bias = np.asarray(beta, np.float64) - np.asarray(mean, np.float64) * scale
    out = out * scale[None, :, None, None] + bias[None, :, None, None]
    return np.maximum(out, 0.0)


if __name__ == "__main__":
    # matrix.forward applies matrix12_k / matrix21_k (Conv2d(out_ch, out_ch, ...)) directly
    # to z / x, so the module only type-checks when in_channels == out_channels.
    N, C, H, W = 2, 8, 16, 16
    OC = C

    key = jax.random.PRNGKey(0)
    keys = iter(jax.random.split(key, 64))

    z = jax.random.normal(next(keys), (N, C, H, W), jnp.float32)
    x = jax.random.normal(next(keys), (N, C, H, W), jnp.float32)

    def make_branch_params():
        return dict(
            weight=0.1 * jax.random.normal(next(keys), (OC, C, 3, 3), jnp.float32),
            gamma=1.0 + 0.1 * jax.random.normal(next(keys), (OC,), jnp.float32),
            beta=0.1 * jax.random.normal(next(keys), (OC,), jnp.float32),
            mean=0.1 * jax.random.normal(next(keys), (OC,), jnp.float32),
            var=jax.random.uniform(next(keys), (OC,), jnp.float32, 0.5, 1.5),
        )

    params_k = [make_branch_params() for _ in range(3)]   # matrix11_k, matrix12_k, matrix21_k
    params_s = [make_branch_params() for _ in range(3)]   # matrix11_s, matrix12_s, matrix21_s

    z_outs, x_outs = matrix_forward(z, x, params_k, params_s)
    z_outs = jax.block_until_ready(z_outs)
    x_outs = jax.block_until_ready(x_outs)

    for outs, inp, params in ((z_outs, z, params_k), (x_outs, x, params_s)):
        for o, p, (dh, dw) in zip(outs, params, _DILATIONS):
            OH, OW = H - 2 * dh, W - 2 * dw
            assert o.shape == (N, OC, OH, OW), o.shape
            ref = _ref_branch(inp, p["weight"], p["gamma"], p["beta"],
                              p["mean"], p["var"], dh, dw)
            got = np.asarray(o, np.float64)
            # bf16 MXU operands with f32 accumulation: error stays well inside 2e-2.
            assert np.allclose(got, ref, rtol=2e-2, atol=2e-2), (
                "max abs err %g" % np.max(np.abs(got - ref)))

    print("KERNEL_OK")
</pallas_src>

<mosaic_0001>
module attributes {stable_mosaic.version = 11 : i64} {
  func.func @_matrix_kernel(%arg0: i32, %arg1: i32, %arg2: memref<1x8x384xbf16, #tpu.memory_space<vmem>>, %arg3: memref<1x9x8x8xbf16, #tpu.memory_space<vmem>>, %arg4: memref<1x8x1xf32, #tpu.memory_space<vmem>>, %arg5: memref<1x1x8x256xf32, #tpu.memory_space<vmem>>) attributes {dimension_semantics = [#tpu.dimension_semantics<parallel>, #tpu.dimension_semantics<parallel>], iteration_bounds = array<i64: 2, 3>, scalar_prefetch = 0 : i64, scratch_operands = 0 : i64, tpu.core_type = #tpu.core_type<tc>, window_params = [{transform_indices = @transform_0, window_bounds = array<i64: 1, 8, 384>}, {transform_indices = @transform_1, window_bounds = array<i64: 1, 9, 8, 8>}, {transform_indices = @transform_2, window_bounds = array<i64: 1, 8, 1>}, {transform_indices = @transform_3, window_bounds = array<i64: 1, 1, 8, 256>}]} {
    %c0 = arith.constant 0 : index
    %c0_0 = arith.constant 0 : index
    %c0_1 = arith.constant 0 : index
    %0 = vector.load %arg2[%c0, %c0_0, %c0_1] : memref<1x8x384xbf16, #tpu.memory_space<vmem>>, vector<1x8x384xbf16>
    %1 = vector.shape_cast %0 : vector<1x8x384xbf16> to vector<8x384xbf16>
    %c0_2 = arith.constant 0 : index
    %c0_3 = arith.constant 0 : index
    %c0_4 = arith.constant 0 : index
    %2 = vector.load %arg4[%c0_2, %c0_3, %c0_4] : memref<1x8x1xf32, #tpu.memory_space<vmem>>, vector<1x8x1xf32>
    %3 = vector.shape_cast %2 : vector<1x8x1xf32> to vector<8x1xf32>
    %c0_i32 = arith.constant 0 : i32
    %4 = arith.cmpi eq, %arg1, %c0_i32 : i32
    %5 = arith.extui %4 : i1 to i32
    %c0_i32_5 = arith.constant 0 : i32
    %6 = arith.cmpi ne, %5, %c0_i32_5 : i32
    scf.if %6 {
      %c0_8 = arith.constant 0 : index
      %c0_9 = arith.constant 0 : index
      %c0_10 = arith.constant 0 : index
      %c0_11 = arith.constant 0 : index
      %13 = vector.load %arg3[%c0_8, %c0_9, %c0_10, %c0_11] : memref<1x9x8x8xbf16, #tpu.memory_space<vmem>>, vector<1x1x8x8xbf16>
      %14 = vector.shape_cast %13 : vector<1x1x8x8xbf16> to vector<8x8xbf16>
      %15 = vector.extract_strided_slice %1 {offsets = [0, 0], sizes = [8, 256], strides = [1, 1]} : vector<8x384xbf16> to vector<8x256xbf16>
      %cst = arith.constant dense<0.000000e+00> : vector<8x256xf32>
      %16 = tpu.matmul %14, %15, %cst {dimension_numbers = #tpu.dot_dimension_numbers<[1], [0], [0], [1], [0, 0, 1, 1], [], []>} : vector<8x8xbf16>, vector<8x256xbf16>, vector<8x256xf32> -> vector<8x256xf32>
      %c0_12 = arith.constant 0 : index
      %c1 = arith.constant 1 : index
      %c0_13 = arith.constant 0 : index
      %c0_14 = arith.constant 0 : index
      %17 = vector.load %arg3[%c0_12, %c1, %c0_13, %c0_14] : memref<1x9x8x8xbf16, #tpu.memory_space<vmem>>, vector<1x1x8x8xbf16>
      %18 = vector.shape_cast %17 : vector<1x1x8x8xbf16> to vector<8x8xbf16>
      %19 = vector.extract_strided_slice %1 {offsets = [0, 1], sizes = [8, 256], strides = [1, 1]} : vector<8x384xbf16> to vector<8x256xbf16>
      %cst_15 = arith.constant dense<0.000000e+00> : vector<8x256xf32>
      %20 = tpu.matmul %18, %19, %cst_15 {dimension_numbers = #tpu.dot_dimension_numbers<[1], [0], [0], [1], [0, 0, 1, 1], [], []>} : vector<8x8xbf16>, vector<8x256xbf16>, vector<8x256xf32> -> vector<8x256xf32>
      %21 = arith.addf %16, %20 : vector<8x256xf32>
      %c0_16 = arith.constant 0 : index
      %c2 = arith.constant 2 : index
      %c0_17 = arith.constant 0 : index
      %c0_18 = arith.constant 0 : index
      %22 = vector.load %arg3[%c0_16, %c2, %c0_17, %c0_18] : memref<1x9x8x8xbf16, #tpu.memory_space<vmem>>, vector<1x1x8x8xbf16>
      %23 = vector.shape_cast %22 : vector<1x1x8x8xbf16> to vector<8x8xbf16>
      %24 = vector.extract_strided_slice %1 {offsets = [0, 2], sizes = [8, 256], strides = [1, 1]} : vector<8x384xbf16> to vector<8x256xbf16>
      %cst_19 = arith.constant dense<0.000000e+00> : vector<8x256xf32>
      %25 = tpu.matmul %23, %24, %cst_19 {dimension_numbers = #tpu.dot_dimension_numbers<[1], [0], [0], [1], [0, 0, 1, 1], [], []>} : vector<8x8xbf16>, vector<8x256xbf16>, vector<8x256xf32> -> vector<8x256xf32>
      %26 = arith.addf %21, %25 : vector<8x256xf32>
      %c0_20 = arith.constant 0 : index
      %c3 = arith.constant 3 : index
      %c0_21 = arith.constant 0 : index
      %c0_22 = arith.constant 0 : index
      %27 = vector.load %arg3[%c0_20, %c3, %c0_21, %c0_22] : memref<1x9x8x8xbf16, #tpu.memory_space<vmem>>, vector<1x1x8x8xbf16>
      %28 = vector.shape_cast %27 : vector<1x1x8x8xbf16> to vector<8x8xbf16>
      %29 = vector.extract_strided_slice %1 {offsets = [0, 16], sizes = [8, 256], strides = [1, 1]} : vector<8x384xbf16> to vector<8x256xbf16>
      %cst_23 = arith.constant dense<0.000000e+00> : vector<8x256xf32>
      %30 = tpu.matmul %28, %29, %cst_23 {dimension_numbers = #tpu.dot_dimension_numbers<[1], [0], [0], [1], [0, 0, 1, 1], [], []>} : vector<8x8xbf16>, vector<8x256xbf16>, vector<8x256xf32> -> vector<8x256xf32>
      %31 = arith.addf %26, %30 : vector<8x256xf32>
      %c0_24 = arith.constant 0 : index
      %c4 = arith.constant 4 : index
      %c0_25 = arith.constant 0 : index
      %c0_26 = arith.constant 0 : index
      %32 = vector.load %arg3[%c0_24, %c4, %c0_25, %c0_26] : memref<1x9x8x8xbf16, #tpu.memory_space<vmem>>, vector<1x1x8x8xbf16>
      %33 = vector.shape_cast %32 : vector<1x1x8x8xbf16> to vector<8x8xbf16>
      %34 = vector.extract_strided_slice %1 {offsets = [0, 17], sizes = [8, 256], strides = [1, 1]} : vector<8x384xbf16> to vector<8x256xbf16>
      %cst_27 = arith.constant dense<0.000000e+00> : vector<8x256xf32>
      %35 = tpu.matmul %33, %34, %cst_27 {dimension_numbers = #tpu.dot_dimension_numbers<[1], [0], [0], [1], [0, 0, 1, 1], [], []>} : vector<8x8xbf16>, vector<8x256xbf16>, vector<8x256xf32> -> vector<8x256xf32>
      %36 = arith.addf %31, %35 : vector<8x256xf32>
      %c0_28 = arith.constant 0 : index
      %c5 = arith.constant 5 : index
      %c0_29 = arith.constant 0 : index
      %c0_30 = arith.constant 0 : index
      %37 = vector.load %arg3[%c0_28, %c5, %c0_29, %c0_30] : memref<1x9x8x8xbf16, #tpu.memory_space<vmem>>, vector<1x1x8x8xbf16>
      %38 = vector.shape_cast %37 : vector<1x1x8x8xbf16> to vector<8x8xbf16>
      %39 = vector.extract_strided_slice %1 {offsets = [0, 18], sizes = [8, 256], strides = [1, 1]} : vector<8x384xbf16> to vector<8x256xbf16>
      %cst_31 = arith.constant dense<0.000000e+00> : vector<8x256xf32>
      %40 = tpu.matmul %38, %39, %cst_31 {dimension_numbers = #tpu.dot_dimension_numbers<[1], [0], [0], [1], [0, 0, 1, 1], [], []>} : vector<8x8xbf16>, vector<8x256xbf16>, vector<8x256xf32> -> vector<8x256xf32>
      %41 = arith.addf %36, %40 : vector<8x256xf32>
      %c0_32 = arith.constant 0 : index
      %c6 = arith.constant 6 : index
      %c0_33 = arith.constant 0 : index
      %c0_34 = arith.constant 0 : index
      %42 = vector.load %arg3[%c0_32, %c6, %c0_33, %c0_34] : memref<1x9x8x8xbf16, #tpu.memory_space<vmem>>, vector<1x1x8x8xbf16>
      %43 = vector.shape_cast %42 : vector<1x1x8x8xbf16> to vector<8x8xbf16>
      %44 = vector.extract_strided_slice %1 {offsets = [0, 32], sizes = [8, 256], strides = [1, 1]} : vector<8x384xbf16> to vector<8x256xbf16>
      %cst_35 = arith.constant dense<0.000000e+00> : vector<8x256xf32>
      %45 = tpu.matmul %43, %44, %cst_35 {dimension_numbers = #tpu.dot_dimension_numbers<[1], [0], [0], [1], [0, 0, 1, 1], [], []>} : vector<8x8xbf16>, vector<8x256xbf16>, vector<8x256xf32> -> vector<8x256xf32>
      %46 = arith.addf %41, %45 : vector<8x256xf32>
      %c0_36 = arith.constant 0 : index
      %c7 = arith.constant 7 : index
      %c0_37 = arith.constant 0 : index
      %c0_38 = arith.constant 0 : index
      %47 = vector.load %arg3[%c0_36, %c7, %c0_37, %c0_38] : memref<1x9x8x8xbf16, #tpu.memory_space<vmem>>, vector<1x1x8x8xbf16>
      %48 = vector.shape_cast %47 : vector<1x1x8x8xbf16> to vector<8x8xbf16>
      %49 = vector.extract_strided_slice %1 {offsets = [0, 33], sizes = [8, 256], strides = [1, 1]} : vector<8x384xbf16> to vector<8x256xbf16>
      %cst_39 = arith.constant dense<0.000000e+00> : vector<8x256xf32>
      %50 = tpu.matmul %48, %49, %cst_39 {dimension_numbers = #tpu.dot_dimension_numbers<[1], [0], [0], [1], [0, 0, 1, 1], [], []>} : vector<8x8xbf16>, vector<8x256xbf16>, vector<8x256xf32> -> vector<8x256xf32>
      %51 = arith.addf %46, %50 : vector<8x256xf32>
      %c0_40 = arith.constant 0 : index
      %c8 = arith.constant 8 : index
      %c0_41 = arith.constant 0 : index
      %c0_42 = arith.constant 0 : index
      %52 = vector.load %arg3[%c0_40, %c8, %c0_41, %c0_42] : memref<1x9x8x8xbf16, #tpu.memory_space<vmem>>, vector<1x1x8x8xbf16>
      %53 = vector.shape_cast %52 : vector<1x1x8x8xbf16> to vector<8x8xbf16>
      %54 = vector.extract_strided_slice %1 {offsets = [0, 34], sizes = [8, 256], strides = [1, 1]} : vector<8x384xbf16> to vector<8x256xbf16>
      %cst_43 = arith.constant dense<0.000000e+00> : vector<8x256xf32>
      %55 = tpu.matmul %53, %54, %cst_43 {dimension_numbers = #tpu.dot_dimension_numbers<[1], [0], [0], [1], [0, 0, 1, 1], [], []>} : vector<8x8xbf16>, vector<8x256xbf16>, vector<8x256xf32> -> vector<8x256xf32>
      %56 = arith.addf %51, %55 : vector<8x256xf32>
      %57 = vector.broadcast %3 : vector<8x1xf32> to vector<8x256xf32>
      %58 = arith.addf %56, %57 : vector<8x256xf32>
      %cst_44 = arith.constant 0.000000e+00 : f32
      %59 = vector.broadcast %cst_44 : f32 to vector<8x256xf32>
      %60 = arith.maximumf %58, %59 : vector<8x256xf32>
      %c0_45 = arith.constant 0 : index
      %c0_46 = arith.constant 0 : index
      %c0_47 = arith.constant 0 : index
      %c0_48 = arith.constant 0 : index
      %61 = vector.load %arg5[%c0_45, %c0_46, %c0_47, %c0_48] : memref<1x1x8x256xf32, #tpu.memory_space<vmem>>, vector<1x1x8x256xf32>
      %62 = vector.shape_cast %61 : vector<1x1x8x256xf32> to vector<8x256xf32>
      %63 = vector.shape_cast %60 : vector<8x256xf32> to vector<1x1x8x256xf32>
      tpu.vector_store %arg5[%c0_45, %c0_46, %c0_47, %c0_48], %63 {strides = array<i32>} : memref<1x1x8x256xf32, #tpu.memory_space<vmem>>, vector<1x1x8x256xf32>,
    } else {
    }
    %c1_i32 = arith.constant 1 : i32
    %7 = arith.cmpi eq, %arg1, %c1_i32 : i32
    %8 = arith.extui %7 : i1 to i32
    %c0_i32_6 = arith.constant 0 : i32
    %9 = arith.cmpi ne, %8, %c0_i32_6 : i32
    scf.if %9 {
      %c0_8 = arith.constant 0 : index
      %c0_9 = arith.constant 0 : index
      %c0_10 = arith.constant 0 : index
      %c0_11 = arith.constant 0 : index
      %13 = vector.load %arg3[%c0_8, %c0_9, %c0_10, %c0_11] : memref<1x9x8x8xbf16, #tpu.memory_space<vmem>>, vector<1x1x8x8xbf16>
      %14 = vector.shape_cast %13 : vector<1x1x8x8xbf16> to vector<8x8xbf16>
      %15 = vector.extract_strided_slice %1 {offsets = [0, 0], sizes = [8, 256], strides = [1, 1]} : vector<8x384xbf16> to vector<8x256xbf16>
      %cst = arith.constant dense<0.000000e+00> : vector<8x256xf32>
      %16 = tpu.matmul %14, %15, %cst {dimension_numbers = #tpu.dot_dimension_numbers<[1], [0], [0], [1], [0, 0, 1, 1], [], []>} : vector<8x8xbf16>, vector<8x256xbf16>, vector<8x256xf32> -> vector<8x256xf32>
      %c0_12 = arith.constant 0 : index
      %c1 = arith.constant 1 : index
      %c0_13 = arith.constant 0 : index
      %c0_14 = arith.constant 0 : index
      %17 = vector.load %arg3[%c0_12, %c1, %c0_13, %c0_14] : memref<1x9x8x8xbf16, #tpu.memory_space<vmem>>, vector<1x1x8x8xbf16>
      %18 = vector.shape_cast %17 : vector<1x1x8x8xbf16> to vector<8x8xbf16>
      %19 = vector.extract_strided_slice %1 {offsets = [0, 1], sizes = [8, 256], strides = [1, 1]} : vector<8x384xbf16> to vector<8x256xbf16>
      %cst_15 = arith.constant dense<0.000000e+00> : vector<8x256xf32>
      %20 = tpu.matmul %18, %19, %cst_15 {dimension_numbers = #tpu.dot_dimension_numbers<[1], [0], [0], [1], [0, 0, 1, 1], [], []>} : vector<8x8xbf16>, vector<8x256xbf16>, vector<8x256xf32> -> vector<8x256xf32>
      %21 = arith.addf %16, %20 : vector<8x256xf32>
      %c0_16 = arith.constant 0 : index
      %c2 = arith.constant 2 : index
      %c0_17 = arith.constant 0 : index
      %c0_18 = arith.constant 0 : index
      %22 = vector.load %arg3[%c0_16, %c2, %c0_17, %c0_18] : memref<1x9x8x8xbf16, #tpu.memory_space<vmem>>, vector<1x1x8x8xbf16>
      %23 = vector.shape_cast %22 : vector<1x1x8x8xbf16> to vector<8x8xbf16>
      %24 = vector.extract_strided_slice %1 {offsets = [0, 2], sizes = [8, 256], strides = [1, 1]} : vector<8x384xbf16> to vector<8x256xbf16>
      %cst_19 = arith.constant dense<0.000000e+00> : vector<8x256xf32>
      %25 = tpu.matmul %23, %24, %cst_19 {dimension_numbers = #tpu.dot_dimension_numbers<[1], [0], [0], [1], [0, 0, 1, 1], [], []>} : vector<8x8xbf16>, vector<8x256xbf16>, vector<8x256xf32> -> vector<8x256xf32>
      %26 = arith.addf %21, %25 : vector<8x256xf32>
      %c0_20 = arith.constant 0 : index
      %c3 = arith.constant 3 : index
      %c0_21 = arith.constant 0 : index
      %c0_22 = arith.constant 0 : index
      %27 = vector.load %arg3[%c0_20, %c3, %c0_21, %c0_22] : memref<1x9x8x8xbf16, #tpu.memory_space<vmem>>, vector<1x1x8x8xbf16>
      %28 = vector.shape_cast %27 : vector<1x1x8x8xbf16> to vector<8x8xbf16>
      %29 = vector.extract_strided_slice %1 {offsets = [0, 32], sizes = [8, 256], strides = [1, 1]} : vector<8x384xbf16> to vector<8x256xbf16>
      %cst_23 = arith.constant dense<0.000000e+00> : vector<8x256xf32>
      %30 = tpu.matmul %28, %29, %cst_23 {dimension_numbers = #tpu.dot_dimension_numbers<[1], [0], [0], [1], [0, 0, 1, 1], [], []>} : vector<8x8xbf16>, vector<8x256xbf16>, vector<8x256xf32> -> vector<8x256xf32>
      %31 = arith.addf %26, %30 : vector<8x256xf32>
      %c0_24 = arith.constant 0 : index
      %c4 = arith.constant 4 : index
      %c0_25 = arith.constant 0 : index
      %c0_26 = arith.constant 0 : index
      %32 = vector.load %arg3[%c0_24, %c4, %c0_25, %c0_26] : memref<1x9x8x8xbf16, #tpu.memory_space<vmem>>, vector<1x1x8x8xbf16>
      %33 = vector.shape_cast %32 : vector<1x1x8x8xbf16> to vector<8x8xbf16>
      %34 = vector.extract_strided_slice %1 {offsets = [0, 33], sizes = [8, 256], strides = [1, 1]} : vector<8x384xbf16> to vector<8x256xbf16>
      %cst_27 = arith.constant dense<0.000000e+00> : vector<8x256xf32>
      %35 = tpu.matmul %33, %34, %cst_27 {dimension_numbers = #tpu.dot_dimension_numbers<[1], [0], [0], [1], [0, 0, 1, 1], [], []>} : vector<8x8xbf16>, vector<8x256xbf16>, vector<8x256xf32> -> vector<8x256xf32>
      %36 = arith.addf %31, %35 : vector<8x256xf32>
      %c0_28 = arith.constant 0 : index
      %c5 = arith.constant 5 : index
      %c0_29 = arith.constant 0 : index
      %c0_30 = arith.constant 0 : index
      %37 = vector.load %arg3[%c0_28, %c5, %c0_29, %c0_30] : memref<1x9x8x8xbf16, #tpu.memory_space<vmem>>, vector<1x1x8x8xbf16>
      %38 = vector.shape_cast %37 : vector<1x1x8x8xbf16> to vector<8x8xbf16>
      %39 = vector.extract_strided_slice %1 {offsets = [0, 34], sizes = [8, 256], strides = [1, 1]} : vector<8x384xbf16> to vector<8x256xbf16>
      %cst_31 = arith.constant dense<0.000000e+00> : vector<8x256xf32>
      %40 = tpu.matmul %38, %39, %cst_31 {dimension_numbers = #tpu.dot_dimension_numbers<[1], [0], [0], [1], [0, 0, 1, 1], [], []>} : vector<8x8xbf16>, vector<8x256xbf16>, vector<8x256xf32> -> vector<8x256xf32>
      %41 = arith.addf %36, %40 : vector<8x256xf32>
      %c0_32 = arith.constant 0 : index
      %c6 = arith.constant 6 : index
      %c0_33 = arith.constant 0 : index
      %c0_34 = arith.constant 0 : index
      %42 = vector.load %arg3[%c0_32, %c6, %c0_33, %c0_34] : memref<1x9x8x8xbf16, #tpu.memory_space<vmem>>, vector<1x1x8x8xbf16>
      %43 = vector.shape_cast %42 : vector<1x1x8x8xbf16> to vector<8x8xbf16>
      %44 = vector.extract_strided_slice %1 {offsets = [0, 64], sizes = [8, 256], strides = [1, 1]} : vector<8x384xbf16> to vector<8x256xbf16>
      %cst_35 = arith.constant dense<0.000000e+00> : vector<8x256xf32>
      %45 = tpu.matmul %43, %44, %cst_35 {dimension_numbers = #tpu.dot_dimension_numbers<[1], [0], [0], [1], [0, 0, 1, 1], [], []>} : vector<8x8xbf16>, vector<8x256xbf16>, vector<8x256xf32> -> vector<8x256xf32>
      %46 = arith.addf %41, %45 : vector<8x256xf32>
      %c0_36 = arith.constant 0 : index
      %c7 = arith.constant 7 : index
      %c0_37 = arith.constant 0 : index
      %c0_38 = arith.constant 0 : index
      %47 = vector.load %arg3[%c0_36, %c7, %c0_37, %c0_38] : memref<1x9x8x8xbf16, #tpu.memory_space<vmem>>, vector<1x1x8x8xbf16>
      %48 = vector.shape_cast %47 : vector<1x1x8x8xbf16> to vector<8x8xbf16>
      %49 = vector.extract_strided_slice %1 {offsets = [0, 65], sizes = [8, 256], strides = [1, 1]} : vector<8x384xbf16> to vector<8x256xbf16>
      %cst_39 = arith.constant dense<0.000000e+00> : vector<8x256xf32>
      %50 = tpu.matmul %48, %49, %cst_39 {dimension_numbers = #tpu.dot_dimension_numbers<[1], [0], [0], [1], [0, 0, 1, 1], [], []>} : vector<8x8xbf16>, vector<8x256xbf16>, vector<8x256xf32> -> vector<8x256xf32>
      %51 = arith.addf %46, %50 : vector<8x256xf32>
      %c0_40 = arith.constant 0 : index
      %c8 = arith.constant 8 : index
      %c0_41 = arith.constant 0 : index
      %c0_42 = arith.constant 0 : index
      %52 = vector.load %arg3[%c0_40, %c8, %c0_41, %c0_42] : memref<1x9x8x8xbf16, #tpu.memory_space<vmem>>, vector<1x1x8x8xbf16>
      %53 = vector.shape_cast %52 : vector<1x1x8x8xbf16> to vector<8x8xbf16>
      %54 = vector.extract_strided_slice %1 {offsets = [0, 66], sizes = [8, 256], strides = [1, 1]} : vector<8x384xbf16> to vector<8x256xbf16>
      %cst_43 = arith.constant dense<0.000000e+00> : vector<8x256xf32>
      %55 = tpu.matmul %53, %54, %cst_43 {dimension_numbers = #tpu.dot_dimension_numbers<[1], [0], [0], [1], [0, 0, 1, 1], [], []>} : vector<8x8xbf16>, vector<8x256xbf16>, vector<8x256xf32> -> vector<8x256xf32>
      %56 = arith.addf %51, %55 : vector<8x256xf32>
      %57 = vector.broadcast %3 : vector<8x1xf32> to vector<8x256xf32>
      %58 = arith.addf %56, %57 : vector<8x256xf32>
      %cst_44 = arith.constant 0.000000e+00 : f32
      %59 = vector.broadcast %cst_44 : f32 to vector<8x256xf32>
      %60 = arith.maximumf %58, %59 : vector<8x256xf32>
      %c0_45 = arith.constant 0 : index
      %c0_46 = arith.constant 0 : index
      %c0_47 = arith.constant 0 : index
      %c0_48 = arith.constant 0 : index
      %61 = vector.load %arg5[%c0_45, %c0_46, %c0_47, %c0_48] : memref<1x1x8x256xf32, #tpu.memory_space<vmem>>, vector<1x1x8x256xf32>
      %62 = vector.shape_cast %61 : vector<1x1x8x256xf32> to vector<8x256xf32>
      %63 = vector.shape_cast %60 : vector<8x256xf32> to vector<1x1x8x256xf32>
      tpu.vector_store %arg5[%c0_45, %c0_46, %c0_47, %c0_48], %63 {strides = array<i32>} : memref<1x1x8x256xf32, #tpu.memory_space<vmem>>, vector<1x1x8x256xf32>,
    } else {
    }
    %c2_i32 = arith.constant 2 : i32
    %10 = arith.cmpi eq, %arg1, %c2_i32 : i32
    %11 = arith.extui %10 : i1 to i32
    %c0_i32_7 = arith.constant 0 : i32
    %12 = arith.cmpi ne, %11, %c0_i32_7 : i32
    scf.if %12 {
      %c0_8 = arith.constant 0 : index
      %c0_9 = arith.constant 0 : index
      %c0_10 = arith.constant 0 : index
      %c0_11 = arith.constant 0 : index
      %13 = vector.load %arg3[%c0_8, %c0_9, %c0_10, %c0_11] : memref<1x9x8x8xbf16, #tpu.memory_space<vmem>>, vector<1x1x8x8xbf16>
      %14 = vector.shape_cast %13 : vector<1x1x8x8xbf16> to vector<8x8xbf16>
      %15 = vector.extract_strided_slice %1 {offsets = [0, 0], sizes = [8, 256], strides = [1, 1]} : vector<8x384xbf16> to vector<8x256xbf16>
      %cst = arith.constant dense<0.000000e+00> : vector<8x256xf32>
      %16 = tpu.matmul %14, %15, %cst {dimension_numbers = #tpu.dot_dimension_numbers<[1], [0], [0], [1], [0, 0, 1, 1], [], []>} : vector<8x8xbf16>, vector<8x256xbf16>, vector<8x256xf32> -> vector<8x256xf32>
      %c0_12 = arith.constant 0 : index
      %c1 = arith.constant 1 : index
      %c0_13 = arith.constant 0 : index
      %c0_14 = arith.constant 0 : index
      %17 = vector.load %arg3[%c0_12, %c1, %c0_13, %c0_14] : memref<1x9x8x8xbf16, #tpu.memory_space<vmem>>, vector<1x1x8x8xbf16>
      %18 = vector.shape_cast %17 : vector<1x1x8x8xbf16> to vector<8x8xbf16>
      %19 = vector.extract_strided_slice %1 {offsets = [0, 2], sizes = [8, 256], strides = [1, 1]} : vector<8x384xbf16> to vector<8x256xbf16>
      %cst_15 = arith.constant dense<0.000000e+00> : vector<8x256xf32>
      %20 = tpu.matmul %18, %19, %cst_15 {dimension_numbers = #tpu.dot_dimension_numbers<[1], [0], [0], [1], [0, 0, 1, 1], [], []>} : vector<8x8xbf16>, vector<8x256xbf16>, vector<8x256xf32> -> vector<8x256xf32>
      %21 = arith.addf %16, %20 : vector<8x256xf32>
      %c0_16 = arith.constant 0 : index
      %c2 = arith.constant 2 : index
      %c0_17 = arith.constant 0 : index
      %c0_18 = arith.constant 0 : index
      %22 = vector.load %arg3[%c0_16, %c2, %c0_17, %c0_18] : memref<1x9x8x8xbf16, #tpu.memory_space<vmem>>, vector<1x1x8x8xbf16>
      %23 = vector.shape_cast %22 : vector<1x1x8x8xbf16> to vector<8x8xbf16>
      %24 = vector.extract_strided_slice %1 {offsets = [0, 4], sizes = [8, 256], strides = [1, 1]} : vector<8x384xbf16> to vector<8x256xbf16>
      %cst_19 = arith.constant dense<0.000000e+00> : vector<8x256xf32>
      %25 = tpu.matmul %23, %24, %cst_19 {dimension_numbers = #tpu.dot_dimension_numbers<[1], [0], [0], [1], [0, 0, 1, 1], [], []>} : vector<8x8xbf16>, vector<8x256xbf16>, vector<8x256xf32> -> vector<8x256xf32>
      %26 = arith.addf %21, %25 : vector<8x256xf32>
      %c0_20 = arith.constant 0 : index
      %c3 = arith.constant 3 : index
      %c0_21 = arith.constant 0 : index
      %c0_22 = arith.constant 0 : index
      %27 = vector.load %arg3[%c0_20, %c3, %c0_21, %c0_22] : memref<1x9x8x8xbf16, #tpu.memory_space<vmem>>, vector<1x1x8x8xbf16>
      %28 = vector.shape_cast %27 : vector<1x1x8x8xbf16> to vector<8x8xbf16>
      %29 = vector.extract_strided_slice %1 {offsets = [0, 16], sizes = [8, 256], strides = [1, 1]} : vector<8x384xbf16> to vector<8x256xbf16>
      %cst_23 = arith.constant dense<0.000000e+00> : vector<8x256xf32>
      %30 = tpu.matmul %28, %29, %cst_23 {dimension_numbers = #tpu.dot_dimension_numbers<[1], [0], [0], [1], [0, 0, 1, 1], [], []>} : vector<8x8xbf16>, vector<8x256xbf16>, vector<8x256xf32> -> vector<8x256xf32>
      %31 = arith.addf %26, %30 : vector<8x256xf32>
      %c0_24 = arith.constant 0 : index
      %c4 = arith.constant 4 : index
      %c0_25 = arith.constant 0 : index
      %c0_26 = arith.constant 0 : index
      %32 = vector.load %arg3[%c0_24, %c4, %c0_25, %c0_26] : memref<1x9x8x8xbf16, #tpu.memory_space<vmem>>, vector<1x1x8x8xbf16>
      %33 = vector.shape_cast %32 : vector<1x1x8x8xbf16> to vector<8x8xbf16>
      %34 = vector.extract_strided_slice %1 {offsets = [0, 18], sizes = [8, 256], strides = [1, 1]} : vector<8x384xbf16> to vector<8x256xbf16>
      %cst_27 = arith.constant dense<0.000000e+00> : vector<8x256xf32>
      %35 = tpu.matmul %33, %34, %cst_27 {dimension_numbers = #tpu.dot_dimension_numbers<[1], [0], [0], [1], [0, 0, 1, 1], [], []>} : vector<8x8xbf16>, vector<8x256xbf16>, vector<8x256xf32> -> vector<8x256xf32>
      %36 = arith.addf %31, %35 : vector<8x256xf32>
      %c0_28 = arith.constant 0 : index
      %c5 = arith.constant 5 : index
      %c0_29 = arith.constant 0 : index
      %c0_30 = arith.constant 0 : index
      %37 = vector.load %arg3[%c0_28, %c5, %c0_29, %c0_30] : memref<1x9x8x8xbf16, #tpu.memory_space<vmem>>, vector<1x1x8x8xbf16>
      %38 = vector.shape_cast %37 : vector<1x1x8x8xbf16> to vector<8x8xbf16>
      %39 = vector.extract_strided_slice %1 {offsets = [0, 20], sizes = [8, 256], strides = [1, 1]} : vector<8x384xbf16> to vector<8x256xbf16>
      %cst_31 = arith.constant dense<0.000000e+00> : vector<8x256xf32>
      %40 = tpu.matmul %38, %39, %cst_31 {dimension_numbers = #tpu.dot_dimension_numbers<[1], [0], [0], [1], [0, 0, 1, 1], [], []>} : vector<8x8xbf16>, vector<8x256xbf16>, vector<8x256xf32> -> vector<8x256xf32>
      %41 = arith.addf %36, %40 : vector<8x256xf32>
      %c0_32 = arith.constant 0 : index
      %c6 = arith.constant 6 : index
      %c0_33 = arith.constant 0 : index
      %c0_34 = arith.constant 0 : index
      %42 = vector.load %arg3[%c0_32, %c6, %c0_33, %c0_34] : memref<1x9x8x8xbf16, #tpu.memory_space<vmem>>, vector<1x1x8x8xbf16>
      %43 = vector.shape_cast %42 : vector<1x1x8x8xbf16> to vector<8x8xbf16>
      %44 = vector.extract_strided_slice %1 {offsets = [0, 32], sizes = [8, 256], strides = [1, 1]} : vector<8x384xbf16> to vector<8x256xbf16>
      %cst_35 = arith.constant dense<0.000000e+00> : vector<8x256xf32>
      %45 = tpu.matmul %43, %44, %cst_35 {dimension_numbers = #tpu.dot_dimension_numbers<[1], [0], [0], [1], [0, 0, 1, 1], [], []>} : vector<8x8xbf16>, vector<8x256xbf16>, vector<8x256xf32> -> vector<8x256xf32>
      %46 = arith.addf %41, %45 : vector<8x256xf32>
      %c0_36 = arith.constant 0 : index
      %c7 = arith.constant 7 : index
      %c0_37 = arith.constant 0 : index
      %c0_38 = arith.constant 0 : index
      %47 = vector.load %arg3[%c0_36, %c7, %c0_37, %c0_38] : memref<1x9x8x8xbf16, #tpu.memory_space<vmem>>, vector<1x1x8x8xbf16>
      %48 = vector.shape_cast %47 : vector<1x1x8x8xbf16> to vector<8x8xbf16>
      %49 = vector.extract_strided_slice %1 {offsets = [0, 34], sizes = [8, 256], strides = [1, 1]} : vector<8x384xbf16> to vector<8x256xbf16>
      %cst_39 = arith.constant dense<0.000000e+00> : vector<8x256xf32>
      %50 = tpu.matmul %48, %49, %cst_39 {dimension_numbers = #tpu.dot_dimension_numbers<[1], [0], [0], [1], [0, 0, 1, 1], [], []>} : vector<8x8xbf16>, vector<8x256xbf16>, vector<8x256xf32> -> vector<8x256xf32>
      %51 = arith.addf %46, %50 : vector<8x256xf32>
      %c0_40 = arith.constant 0 : index
      %c8 = arith.constant 8 : index
      %c0_41 = arith.constant 0 : index
      %c0_42 = arith.constant 0 : index
      %52 = vector.load %arg3[%c0_40, %c8, %c0_41, %c0_42] : memref<1x9x8x8xbf16, #tpu.memory_space<vmem>>, vector<1x1x8x8xbf16>
      %53 = vector.shape_cast %52 : vector<1x1x8x8xbf16> to vector<8x8xbf16>
      %54 = vector.extract_strided_slice %1 {offsets = [0, 36], sizes = [8, 256], strides = [1, 1]} : vector<8x384xbf16> to vector<8x256xbf16>
      %cst_43 = arith.constant dense<0.000000e+00> : vector<8x256xf32>
      %55 = tpu.matmul %53, %54, %cst_43 {dimension_numbers = #tpu.dot_dimension_numbers<[1], [0], [0], [1], [0, 0, 1, 1], [], []>} : vector<8x8xbf16>, vector<8x256xbf16>, vector<8x256xf32> -> vector<8x256xf32>
      %56 = arith.addf %51, %55 : vector<8x256xf32>
      %57 = vector.broadcast %3 : vector<8x1xf32> to vector<8x256xf32>
      %58 = arith.addf %56, %57 : vector<8x256xf32>
      %cst_44 = arith.constant 0.000000e+00 : f32
      %59 = vector.broadcast %cst_44 : f32 to vector<8x256xf32>
      %60 = arith.maximumf %58, %59 : vector<8x256xf32>
      %c0_45 = arith.constant 0 : index
      %c0_46 = arith.constant 0 : index
      %c0_47 = arith.constant 0 : index
      %c0_48 = arith.constant 0 : index
      %61 = vector.load %arg5[%c0_45, %c0_46, %c0_47, %c0_48] : memref<1x1x8x256xf32, #tpu.memory_space<vmem>>, vector<1x1x8x256xf32>
      %62 = vector.shape_cast %61 : vector<1x1x8x256xf32> to vector<8x256xf32>
      %63 = vector.shape_cast %60 : vector<8x256xf32> to vector<1x1x8x256xf32>
      tpu.vector_store %arg5[%c0_45, %c0_46, %c0_47, %c0_48], %63 {strides = array<i32>} : memref<1x1x8x256xf32, #tpu.memory_space<vmem>>, vector<1x1x8x256xf32>,
    } else {
    }
    return
  }
  func.func @transform_0(%arg0: i32, %arg1: i32) -> (i32, i32, i32) {
    %c0_i32 = arith.constant 0 : i32
    %c0_i32_0 = arith.constant 0 : i32
    %c0_i32_1 = arith.constant 0 : i32
    return %arg0, %c0_i32, %c0_i32_0 : i32, i32, i32
  }
  func.func @transform_1(%arg0: i32, %arg1: i32) -> (i32, i32, i32, i32) {
    %c0_i32 = arith.constant 0 : i32
    %c0_i32_0 = arith.constant 0 : i32
    %c0_i32_1 = arith.constant 0 : i32
    %c0_i32_2 = arith.constant 0 : i32
    return %arg1, %c0_i32, %c0_i32_0, %c0_i32_1 : i32, i32, i32, i32
  }
  func.func @transform_2(%arg0: i32, %arg1: i32) -> (i32, i32, i32) {
    %c0_i32 = arith.constant 0 : i32
    %c0_i32_0 = arith.constant 0 : i32
    %c0_i32_1 = arith.constant 0 : i32
    return %arg1, %c0_i32, %c0_i32_0 : i32, i32, i32
  }
  func.func @transform_3(%arg0: i32, %arg1: i32) -> (i32, i32, i32, i32) {
    %c0_i32 = arith.constant 0 : i32
    %c0_i32_0 = arith.constant 0 : i32
    %c0_i32_1 = arith.constant 0 : i32
    return %arg0, %arg1, %c0_i32, %c0_i32_0 : i32, i32, i32, i32
  }
}

</mosaic_0001>

<bundles_post_ra>
// kernel: tpu_custom_call.1
= control target key start
LH: loop header
LB: loop body
LE: loop exit
PB: predicated region body
PF: predicated region fallthrough
CT: control target
= control target key end

     0   :  { %8 = vsyncpa [#allocation3], 0  ;;  %s2310_s0 = inlined_call_operand.vmem [shape: bf16[2,8,384], index: 0, kind: input, shape index: {}]   ;;  %s2311_s1 = inlined_call_operand.vmem [shape: bf16[3,9,8,8], index: 1, kind: input, shape index: {}]   ;;  %s2312_s2 = inlined_call_operand.vmem [shape: f32[3,8,1], index: 2, kind: input, shape index: {}]   ;;  %s2313_s3 = inlined_call_operand.hbm [shape: f32[2,3,8,256], index: 3, kind: output, shape index: {}]  }
   0x1   :  { %10 = vsyncpa [#allocation3 + $0x1], 0  ;;  %s2011_s12 = smov 0   ;;  %s2013_s13 = smov 0  }
   0x2   :  { %s2015_s14 = smov 0   ;;  %s2017_s15 = smov 0  }
   0x3   :  { %s2019_s16 = smov 0   ;;  %s2021_s17 = smov 0  }
   0x4   :  { %s2023_s18 = smov 0   ;;  %s2025_s19 = smov 0  }
   0x5 LB: > { %s1669_s20 = sadd.s32 4294967295, %s1962_s19   ;;  %s1670_s21 = sadd.s32 4294967294, %s1962_s19   ;;  %s1962_s19 = sphi %s2025_s19, %s16_s19   ;;  %s1958_s18 = sphi %s2023_s18, %s2328_s18   ;;  %s1954_s17 = sphi %s2021_s17, %s2327_s17   ;;  %s1950_s16 = sphi %s2019_s16, %s2326_s16   ;;  %s1946_s15 = sphi %s2017_s15, %s2325_s15   ;;  %s1942_s14 = sphi %s2015_s14, %s2324_s14   ;;  %s1938_s13 = sphi %s2013_s13, %s2323_s13   ;;  %s1934_s12 = sphi %s2011_s12, %s2322_s12  }
   0x6   : > { %s25_s22 = sadd.s32 1, %s1954_s17  ;;  %s28_s23 = sadd.s32 1, %s1958_s18 }
   0x7   : > { %p26_p0 = scmp.ge.s32.totalorder %s25_s22, 3  ;;  %p125_p1 = scmp.ne.s32.totalorder %s1942_s14, %s1938_s13 }
   0x8   : > { %p126_p2 = scmp.eq.s32.totalorder %s1669_s20, 5  ;;  %p131_p5 = scmp.ne.s32.totalorder %s1938_s13, %s1934_s12 }
   0x9   : > { %s2330_s22 = smov (%p26_p0, %s25_s22), 0  ;;  %s2332_s23 = smov (!%p26_p0, %s28_s23), %s1958_s18 }
   0xa   : > { %2316 = sst [smem:[#allocation5_spill]] %s2330_s22  ;;  %s111_s24 = ssub.s32 %s1954_s17, %s2330_s22 }
   0xb   : > { %p2062_p3 = por %p126_p2, %p125_p1  ;;  %p30_p4 = scmp.ge.s32.totalorder %s2332_s23, 2 }
   0xc   : > { %p132_p6 = scmp.eq.s32.totalorder %s1670_s21, 5  ;;  %p1673_p7 = scmp.ge.s32.totalorder %s1962_s19, 1 }
   0xd   : > { %s2334_s23 = smov (%p30_p4, %s2332_s23), 0  ;;  %p173_p9 = scmp.lt.s32.totalorder %s1962_s19, 7 }
   0xe   : > { %2318 = sst [smem:[#allocation6_spill]] %s2334_s23  ;;  %p2071_p8 = por %p132_p6, %p131_p5 }
   0xf   : > { %s110_s27 = ssub.s32 %s1958_s18, %s2334_s23  ;;  %s115_s28 = sadd.s32 1, %s1942_s14 }
  0x10   : > { %s112_s29 = sor.u32 %s111_s24, %s110_s27  ;;  %p174_p10 = pnand %p1673_p7, %p173_p9 }
  0x11   : > { %p113_p11 = scmp.eq.s32.totalorder %s112_s29, 0  ;;  %s203_s4 = sand.u32 (!%p174_p10), 1, %s1938_s13  }
  0x12   : > { %177 = sbr.rel (%p174_p10) target bundleno = 1055 (0x41f), region = 32  ;;  %p206_p12 = scmp.lt.s32.totalorder (!%p174_p10), %s1950_s16, 1 }
  0x13   : > { %s2080_s30 = scalar_select %p113_p11, %s1942_s14, %s115_s28  }
  0x14   : > { %s1674_s5 = sshll.u32 (!%p174_p10), %s203_s4, 4  ;;  %p211_p13 = scmp.lt.s32.totalorder (!%p174_p10), %s1946_s15, 2 }
  0x15   : > { %p1678_p0 = scmp.ne.s32.totalorder (!%p174_p10), %s1946_s15, 0 }
  0x17   : > { %s207_s6 = scalar_select %p206_p12, %s1950_s16, 1 }
  0x18   : > { %s212_s7 = scalar_select %p211_p13, %s1946_s15, 2 }
  0x19   : > { %s1764_s8 = smul.u32 12, %s207_s6  ;;  %s2106_s6 = scalar_lea.vmem [#allocation2], %s1674_s5 }
  0x1a   : > { %s1765_s9 = smul.u32 36, %s212_s7  ;;  %s1677_s10 = sshll.u32 %s212_s7, 3 }
  0x1b   : > { %s210_s21 = scalar_lea.vmem %s2310_s0, %s1764_s8  ;;  %s219_s28 = scalar_lea.vmem %s2312_s2, %s1677_s10 }
  0x1c   : > { %s2098_s22 = scalar_lea.vmem %s2311_s1, %s1765_s9  ;;  %v2100_v0 = vld [vmem:[%s210_s21] sm:$0xff]  ;;  %v2102_v1 = vld [vmem:[%s210_s21 + $0x8] sm:$0xf]  ;;  %227 = sbr.rel (%p1678_p0) target bundleno = 363 (0x16b), region = 36 }
  0x1d   : > { %v2104_v2 = vld [vmem:[%s219_s28] sm:$0xff]  ;;  %s1964_s23 = smov (!%p1678_p0), 127   ;;  %s1965_s7 = smov (!%p1678_p0), 126  }
  0x1e   : > { %s1966_s5 = smov (!%p1678_p0), 112   ;;  %s1967_s8 = smov (!%p1678_p0), 111  }
  0x1f   : > { %s1968_s9 = smov (!%p1678_p0), 110   ;;  %s1969_s10 = smov (!%p1678_p0), 96  }
  0x20   : > { %s1970_s11 = smov (!%p1678_p0), 95   ;;  %s1971_s20 = smov (!%p1678_p0), 94  }
  0x21   : > { %v235_v3 = vunpack.c.l.b16 %v2102_v1  ;;  %v233_v4 = vunpack.c.l.b16 %v2100_v0  ;;  %v234_v5 = vunpack.c.h.b16 %v2100_v0  ;;  %vm252_vm0 = vcmask 1043456   ;;  %v228_v11 = vld [vmem:[%s2098_s22] sm:$0xf]  ;;  %v1679_v27 = vld [vmem:[%s2098_s22 + $0x4] sm:$0xf] }
  0x22   : > { %vm248_vm1 = vcmask 64512   ;;  %vm328_vm2 = vcmask 1031168   ;;  %vm245_vm3 = vcmask 1039360   ;;  %vm376_vm4 = vcmask 916480   ;;  %v1687_v35 = vld [vmem:[%s2098_s22 + $0xc] sm:$0xf] }
  0x23   : > { %v238_v6 = vpack.c.b16 %v235_v3, %v235_v3  ;;  %v236_v7 = vpack.c.b16 %v233_v4, %v233_v4  ;;  %v237_v8 = vpack.c.b16 %v234_v5, %v234_v5  ;;  %vm424_vm5 = vcmask 908288   ;;  %v1684_v43 = vld [vmem:[%s2098_s22 + $0x8] sm:$0xf]  ;;  %v1693_v50 = vld [vmem:[%s2098_s22 + $0x14] sm:$0xf] }
  0x24   : > { %vm472_vm6 = vcmask 900096   ;;  %vm520_vm7 = vcmask 785408   ;;  %v1690_v58 = vld [vmem:[%s2098_s22 + $0x10] sm:$0xf]  ;;  %vm568_vm8 = vcmask 777216   ;;  %v1972_v60 = vmov 0  }
  0x25   : > { %243 = vrot.lane.b32.xlu1 %v238_v6, %s1964_s23  ;;  %239 = vrot.lane.b32.xlu0 %v236_v7, %s1964_s23  ;;  %v289_v9 = vsel %vm252_vm0, %v236_v7, 0  ;;  %v292_v10 = vsel %vm252_vm0, %v237_v8, 0  ;;  %vm616_vm9 = vcmask 769024  }
  0x26   : > { %324 = vrot.lane.b32.xlu2 %v237_v8, %s1965_s7  ;;  %301 = vmatpush.bf16.msra.mxu2 %v289_v9 }
  0x27   : > { %314 = vmatpush.bf16.msra.mxu3 %v292_v10  ;;  %1865 = vset.pattern.permute.xlu0 %v1972_v60 }
  0x29   : > { %1682 = vmatmul.msk.bf16.vlgmr.msra.gmra.mxu2 %vm248_vm1, %v228_v11 }
  0x2a   : > { %1683 = vmatmul.msk.bf16.vlgmr.msra.gmra.mxu3 %vm248_vm1, %v228_v11 }
  0x2d   : > { %322 = vrot.lane.b32.xlu1 %v236_v7, %s1965_s7  ;;  %241 = vrot.lane.b32.xlu0 %v237_v8, %s1964_s23 }
  0x2e   : > { %326 = vrot.lane.b32.xlu2 %v238_v6, %s1965_s7 }
  0x35   : > { %372 = vrot.lane.b32.xlu1 %v237_v8, %s1966_s5  ;;  %370 = vrot.lane.b32.xlu0 %v236_v7, %s1966_s5 }
  0x36   : > { %374 = vrot.lane.b32.xlu2 %v238_v6, %s1966_s5 }
  0x3d   : > { %420 = vrot.lane.b32.xlu1 %v237_v8, %s1967_s8  ;;  %418 = vrot.lane.b32.xlu0 %v236_v7, %s1967_s8 }
  0x3e   : > { %422 = vrot.lane.b32.xlu2 %v238_v6, %s1967_s8 }
  0x45   : > { %468 = vrot.lane.b32.xlu1 %v237_v8, %s1968_s9  ;;  %466 = vrot.lane.b32.xlu0 %v236_v7, %s1968_s9 }
  0x46   : > { %470 = vrot.lane.b32.xlu2 %v238_v6, %s1968_s9 }
  0x4d   : > { %516 = vrot.lane.b32.xlu1 %v237_v8, %s1969_s10  ;;  %514 = vrot.lane.b32.xlu0 %v236_v7, %s1969_s10 }
  0x4e   : > { %518 = vrot.lane.b32.xlu2 %v238_v6, %s1969_s10 }
  0x55   : > { %564 = vrot.lane.b32.xlu1 %v237_v8, %s1970_s11  ;;  %562 = vrot.lane.b32.xlu0 %v236_v7, %s1970_s11 }
  0x56   : > { %566 = vrot.lane.b32.xlu2 %v238_v6, %s1970_s11 }
  0x5d   : > { %612 = vrot.lane.b32.xlu1 %v237_v8, %s1971_s20  ;;  %610 = vrot.lane.b32.xlu0 %v236_v7, %s1971_s20 }
  0x5e   : > { %614 = vrot.lane.b32.xlu2 %v238_v6, %s1971_s20  ;;  %v1699_v6 = vld [vmem:[%s2098_s22 + $0x1c] sm:$0xf] }
  0x65   : > { %658 = vperm.xlu0 %1865, %v2104_v2  }
  0x80   : > { %v325_v12 = vpop.permute.xlu2 %324 }
  0x88   : > { %v327_v13 = vpop.permute.xlu2 %326 }
  0x89   : > { %v330_v17 = vsel %vm328_vm2, %v325_v12, %v327_v13 }
  0x8a   : > { %v338_v23 = vsel %vm252_vm0, %v330_v17, 0 }
  0x90   : > { %v375_v16 = vpop.permute.xlu2 %374 }
  0x97   : > { %v244_v14 = vpop.permute.xlu1 %243  ;;  %v240_v15 = vpop.permute.xlu0 %239 }
  0x98   : > { %v423_v28 = vpop.permute.xlu2 %422 }
  0x9f   : > { %v323_v18 = vpop.permute.xlu1 %322  ;;  %v242_v19 = vpop.permute.xlu0 %241 }
  0xa0   : > { %v246_v20 = vsel %vm245_vm3, %v240_v15, %v242_v19  ;;  %v247_v21 = vsel %vm245_vm3, %v242_v19, %v244_v14  ;;  %v329_v22 = vsel %vm328_vm2, %v323_v18, %v325_v12  ;;  %v471_v42 = vpop.permute.xlu2 %470  ;;  %v1696_v14 = vld [vmem:[%s2098_s22 + $0x18] sm:$0xf]  ;;  %v1702_v15 = vld [vmem:[%s2098_s22 + $0x20] sm:$0xf] }
  0xa1   : > { %v254_v24 = vsel %vm252_vm0, %v246_v20, 0  ;;  %v257_v25 = vsel %vm252_vm0, %v247_v21, 0  ;;  %v335_v26 = vsel %vm252_vm0, %v329_v22, 0 }
  0xa2   : > { %266 = vmatpush.bf16.msra.mxu0 %v254_v24  ;;  %279 = vmatpush.bf16.msra.mxu1 %v257_v25 }
  0xa5   : > { %1680 = vmatmul.msk.bf16.vlgmr.msra.gmra.mxu0 %vm248_vm1, %v1679_v27  ;;  %1681 = vmatmul.msk.bf16.vlgmr.msra.gmra.mxu1 %vm248_vm1, %v1679_v27 }
  0xa6   : > { %347 = vmatpush.bf16.msrb.mxu0 %v335_v26  ;;  %360 = vmatpush.bf16.msrb.mxu1 %v338_v23 }
  0xa7   : > { %v373_v29 = vpop.permute.xlu1 %372  ;;  %v371_v30 = vpop.permute.xlu0 %370 }
  0xa8   : > { %v377_v31 = vsel %vm376_vm4, %v371_v30, %v373_v29  ;;  %v378_v32 = vsel %vm376_vm4, %v373_v29, %v375_v16  ;;  %v519_v51 = vpop.permute.xlu2 %518 }
  0xa9   : > { %v383_v33 = vsel %vm252_vm0, %v377_v31, 0  ;;  %v386_v34 = vsel %vm252_vm0, %v378_v32, 0 }
  0xaa   : > { %395 = vmatpush.bf16.msrb.mxu2 %v383_v33  ;;  %408 = vmatpush.bf16.msrb.mxu3 %v386_v34 }
  0xac   : > { %v303_v16 = vpop.f32.mrf.mxu2 }
  0xad   : > { %1688 = vmatmul.msk.bf16.vlgmr.msrb.gmra.mxu2 %vm248_vm1, %v1687_v35  ;;  %1689 = vmatmul.msk.bf16.vlgmr.msrb.gmra.mxu3 %vm248_vm1, %v1687_v35  ;;  %v316_v17 = vpop.f32.mrf.mxu3 }
  0xaf   : > { %v421_v36 = vpop.permute.xlu1 %420  ;;  %v419_v37 = vpop.permute.xlu0 %418 }
  0xb0   : > { %v426_v38 = vsel %vm424_vm5, %v421_v36, %v423_v28  ;;  %v425_v39 = vsel %vm424_vm5, %v419_v37, %v421_v36  ;;  %v567_v59 = vpop.permute.xlu2 %566 }
  0xb1   : > { %v434_v40 = vsel %vm252_vm0, %v426_v38, 0  ;;  %v431_v41 = vsel %vm252_vm0, %v425_v39, 0 }
  0xb2   : > { %443 = vmatpush.bf16.msra.mxu0 %v431_v41  ;;  %456 = vmatpush.bf16.msra.mxu1 %v434_v40 }
  0xb4   : > { %v305_v18 = vpop.f32.mrf.mxu2 }
  0xb5   : > { %1685 = vmatmul.msk.bf16.vlgmr.msrb.gmra.mxu0 %vm248_vm1, %v1684_v43  ;;  %1686 = vmatmul.msk.bf16.vlgmr.msrb.gmra.mxu1 %vm248_vm1, %v1684_v43  ;;  %v318_v19 = vpop.f32.mrf.mxu3 }
  0xb7   : > { %v469_v44 = vpop.permute.xlu1 %468  ;;  %v467_v45 = vpop.permute.xlu0 %466 }
  0xb8   : > { %v474_v46 = vsel %vm472_vm6, %v469_v44, %v471_v42  ;;  %v473_v47 = vsel %vm472_vm6, %v467_v45, %v469_v44  ;;  %v615_v7 = vpop.permute.xlu2 %614 }
  0xb9   : > { %v482_v48 = vsel %vm252_vm0, %v474_v46, 0  ;;  %v479_v49 = vsel %vm252_vm0, %v473_v47, 0 }
  0xba   : > { %491 = vmatpush.bf16.msra.mxu2 %v479_v49  ;;  %504 = vmatpush.bf16.msra.mxu3 %v482_v48 }
  0xbd   : > { %1694 = vmatmul.msk.bf16.vlgmr.msra.gmra.mxu2 %vm248_vm1, %v1693_v50  ;;  %1695 = vmatmul.msk.bf16.vlgmr.msra.gmra.mxu3 %vm248_vm1, %v1693_v50 }
  0xbf   : > { %v517_v52 = vpop.permute.xlu1 %516  ;;  %v515_v53 = vpop.permute.xlu0 %514 }
  0xc0   : > { %v522_v54 = vsel %vm520_vm7, %v517_v52, %v519_v51  ;;  %v521_v55 = vsel %vm520_vm7, %v515_v53, %v517_v52 }
  0xc1   : > { %v530_v56 = vsel %vm252_vm0, %v522_v54, 0  ;;  %v527_v57 = vsel %vm252_vm0, %v521_v55, 0 }
  0xc2   : > { %539 = vmatpush.bf16.msrb.mxu0 %v527_v57  ;;  %552 = vmatpush.bf16.msrb.mxu1 %v530_v56 }
  0xc5   : > { %1691 = vmatmul.msk.bf16.vlgmr.msra.gmra.mxu0 %vm248_vm1, %v1690_v58  ;;  %1692 = vmatmul.msk.bf16.vlgmr.msra.gmra.mxu1 %vm248_vm1, %v1690_v58 }
  0xc7   : > { %v565_v61 = vpop.permute.xlu1 %564  ;;  %v563_v62 = vpop.permute.xlu0 %562 }
  0xc8   : > { %v570_v63 = vsel %vm568_vm8, %v565_v61, %v567_v59  ;;  %v569_v3 = vsel %vm568_vm8, %v563_v62, %v565_v61 }
  0xc9   : > { %v578_v4 = vsel %vm252_vm0, %v570_v63, 0  ;;  %v575_v5 = vsel %vm252_vm0, %v569_v3, 0 }
  0xca   : > { %587 = vmatpush.bf16.msrb.mxu2 %v575_v5  ;;  %600 = vmatpush.bf16.msrb.mxu3 %v578_v4 }
  0xcd   : > { %1700 = vmatmul.msk.bf16.vlgmr.msrb.gmra.mxu2 %vm248_vm1, %v1699_v6  ;;  %1701 = vmatmul.msk.bf16.vlgmr.msrb.gmra.mxu3 %vm248_vm1, %v1699_v6 }
  0xcf   : > { %v613_v8 = vpop.permute.xlu1 %612  ;;  %v611_v9 = vpop.permute.xlu0 %610 }
  0xd0   : > { %v618_v10 = vsel %vm616_vm9, %v613_v8, %v615_v7  ;;  %v617_v11 = vsel %vm616_vm9, %v611_v9, %v613_v8 }
  0xd1   : > { %v626_v12 = vsel %vm252_vm0, %v618_v10, 0  ;;  %v623_v13 = vsel %vm252_vm0, %v617_v11, 0 }
  0xd2   : > { %635 = vmatpush.bf16.msra.mxu0 %v623_v13  ;;  %648 = vmatpush.bf16.msra.mxu1 %v626_v12 }
  0xd5   : > { %1697 = vmatmul.msk.bf16.vlgmr.msrb.gmra.mxu0 %vm248_vm1, %v1696_v14  ;;  %1698 = vmatmul.msk.bf16.vlgmr.msrb.gmra.mxu1 %vm248_vm1, %v1696_v14 }
  0xd7   : > { %v659_v62 = vpop.permute.xlu0 %658 }
  0xe5   : > { %1703 = vmatmul.msk.bf16.vlgmr.msra.gmra.mxu0 %vm248_vm1, %v1702_v15  ;;  %1704 = vmatmul.msk.bf16.vlgmr.msra.gmra.mxu1 %vm248_vm1, %v1702_v15 }
 0x122   : > { %v268_v20 = vpop.f32.mrf.mxu0  ;;  %v281_v21 = vpop.f32.mrf.mxu1 }
 0x123   : > { %v304_v40 = vadd.f32 %v303_v16, %v268_v20  ;;  %v317_v41 = vadd.f32 %v316_v17, %v281_v21 }
 0x12a   : > { %v270_v22 = vpop.f32.mrf.mxu0  ;;  %v283_v23 = vpop.f32.mrf.mxu1 }
 0x130   : > { %v397_v24 = vpop.f32.mrf.mxu2  ;;  %v410_v25 = vpop.f32.mrf.mxu3 }
 0x132   : > { %v349_v26 = vpop.f32.mrf.mxu0  ;;  %v362_v27 = vpop.f32.mrf.mxu1 }
 0x133   : > { %v366_v44 = vadd.f32 %v349_v26, %v304_v40  ;;  %v367_v45 = vadd.f32 %v362_v27, %v317_v41 }
 0x135   : > { %v414_v48 = vadd.f32 %v397_v24, %v366_v44  ;;  %v415_v49 = vadd.f32 %v410_v25, %v367_v45 }
 0x138   : > { %v399_v28 = vpop.f32.mrf.mxu2  ;;  %v412_v29 = vpop.f32.mrf.mxu3 }
 0x13a   : > { %v351_v30 = vpop.f32.mrf.mxu0  ;;  %v364_v31 = vpop.f32.mrf.mxu1 }
 0x140   : > { %v493_v32 = vpop.f32.mrf.mxu2  ;;  %v506_v33 = vpop.f32.mrf.mxu3 }
 0x142   : > { %v445_v34 = vpop.f32.mrf.mxu0  ;;  %v458_v35 = vpop.f32.mrf.mxu1 }
 0x143   : > { %v462_v50 = vadd.f32 %v445_v34, %v414_v48  ;;  %v463_v51 = vadd.f32 %v458_v35, %v415_v49 }
 0x145   : > { %v510_v56 = vadd.f32 %v493_v32, %v462_v50  ;;  %v511_v57 = vadd.f32 %v506_v33, %v463_v51 }
 0x148   : > { %v495_v36 = vpop.f32.mrf.mxu2  ;;  %v508_v37 = vpop.f32.mrf.mxu3 }
 0x14a   : > { %v447_v38 = vpop.f32.mrf.mxu0  ;;  %v460_v39 = vpop.f32.mrf.mxu1 }
 0x150   : > { %v589_v42 = vpop.f32.mrf.mxu2  ;;  %v602_v43 = vpop.f32.mrf.mxu3 }
 0x152   : > { %v541_v46 = vpop.f32.mrf.mxu0  ;;  %v554_v47 = vpop.f32.mrf.mxu1 }
 0x153   : > { %v558_v58 = vadd.f32 %v541_v46, %v510_v56  ;;  %v559_v59 = vadd.f32 %v554_v47, %v511_v57 }
 0x155   : > { %v606_v60 = vadd.f32 %v589_v42, %v558_v58  ;;  %v607_v61 = vadd.f32 %v602_v43, %v559_v59 }
 0x158   : > { %v591_v52 = vpop.f32.mrf.mxu2  ;;  %v604_v53 = vpop.f32.mrf.mxu3 }
 0x15a   : > { %v543_v54 = vpop.f32.mrf.mxu0  ;;  %v556_v55 = vpop.f32.mrf.mxu1 }
 0x162   : > { %v637_v63 = vpop.f32.mrf.mxu0  ;;  %v650_v3 = vpop.f32.mrf.mxu1 }
 0x163   : > { %v654_v4 = vadd.f32 %v637_v63, %v606_v60  ;;  %v655_v5 = vadd.f32 %v650_v3, %v607_v61 }
 0x165   : > { %v661_v6 = vadd.f32 %v659_v62, %v654_v4  ;;  %v662_v7 = vadd.f32 %v659_v62, %v655_v5 }
 0x167   : > { %v663_v8 = vmax.f32 %v661_v6, 0.0  ;;  %v664_v9 = vmax.f32 %v662_v7, 0.0 }
 0x169   : > { %665 = vst [vmem:[%s2106_s6] sm:$0xff] %v663_v8 }
 0x16a   : > { %666 = vst [vmem:[%s2106_s6 + $0x8] sm:$0xff] %v664_v9  ;;  %v639_v10 = vpop.f32.mrf.mxu0  ;;  %v652_v11 = vpop.f32.mrf.mxu1 }
 0x16b PF: > { %p1705_p1 = scmp.ne.s32.totalorder %s1946_s15, 1 }
 0x16c   : > { %s1973_s21 = smov (!%p1705_p1), 127   ;;  %s1974_s24 = smov (!%p1705_p1), 126  }
 0x16d   : > { %670 = sbr.rel (%p1705_p1) target bundleno = 700 (0x2bc), region = 40  ;;  %s1975_s27 = smov (!%p1705_p1), 96  }
 0x16e   : > { %s1976_s28 = smov (!%p1705_p1), 95   ;;  %s1977_s29 = smov (!%p1705_p1), 94  }
 0x16f   : > { %s1978_s23 = smov (!%p1705_p1), 64   ;;  %s1979_s7 = smov (!%p1705_p1), 63  }
 0x170   : > { %s1980_s5 = smov (!%p1705_p1), 62  }
 0x172   : > { %v678_v12 = vunpack.c.l.b16 %v2102_v1  ;;  %v676_v13 = vunpack.c.l.b16 %v2100_v0  ;;  %v677_v14 = vunpack.c.h.b16 %v2100_v0  ;;  %vm695_vm10 = vcmask 1043456   ;;  %v671_v20 = vld [vmem:[%s2098_s22] sm:$0xf]  ;;  %v1706_v36 = vld [vmem:[%s2098_s22 + $0x4] sm:$0xf] }
 0x173   : > { %vm691_vm11 = vcmask 64512   ;;  %vm771_vm12 = vcmask 1031168   ;;  %vm688_vm13 = vcmask 1039360   ;;  %vm819_vm14 = vcmask 785408   ;;  %v1714_v44 = vld [vmem:[%s2098_s22 + $0xc] sm:$0xf] }
 0x174   : > { %v681_v15 = vpack.c.b16 %v678_v12, %v678_v12  ;;  %v679_v16 = vpack.c.b16 %v676_v13, %v676_v13  ;;  %v680_v17 = vpack.c.b16 %v677_v14, %v677_v14  ;;  %vm867_vm15 = vcmask 777216   ;;  %v1711_v52 = vld [vmem:[%s2098_s22 + $0x8] sm:$0xf]  ;;  %v1720_v59 = vld [vmem:[%s2098_s22 + $0x14] sm:$0xf] }
 0x175   : > { %vm915_vm0 = vcmask 769024   ;;  %vm963_vm1 = vcmask 523264   ;;  %v1717_v6 = vld [vmem:[%s2098_s22 + $0x10] sm:$0xf]  ;;  %vm1011_vm2 = vcmask 515072   ;;  %v1981_v8 = vmov 0  }
 0x176   : > { %686 = vrot.lane.b32.xlu1 %v681_v15, %s1973_s21  ;;  %682 = vrot.lane.b32.xlu0 %v679_v16, %s1973_s21  ;;  %v732_v18 = vsel %vm695_vm10, %v679_v16, 0  ;;  %v735_v19 = vsel %vm695_vm10, %v680_v17, 0  ;;  %vm1059_vm3 = vcmask 506880  }
 0x177   : > { %767 = vrot.lane.b32.xlu2 %v680_v17, %s1974_s24  ;;  %744 = vmatpush.bf16.msra.mxu2 %v732_v18 }
 0x178   : > { %757 = vmatpush.bf16.msra.mxu3 %v735_v19  ;;  %1866 = vset.pattern.permute.xlu0 %v1981_v8 }
 0x17a   : > { %1709 = vmatmul.msk.bf16.vlgmr.msra.gmra.mxu2 %vm691_vm11, %v671_v20 }
 0x17b   : > { %1710 = vmatmul.msk.bf16.vlgmr.msra.gmra.mxu3 %vm691_vm11, %v671_v20 }
 0x17e   : > { %765 = vrot.lane.b32.xlu1 %v679_v16, %s1974_s24  ;;  %684 = vrot.lane.b32.xlu0 %v680_v17, %s1973_s21 }
 0x17f   : > { %769 = vrot.lane.b32.xlu2 %v681_v15, %s1974_s24 }
 0x186   : > { %815 = vrot.lane.b32.xlu1 %v680_v17, %s1975_s27  ;;  %813 = vrot.lane.b32.xlu0 %v679_v16, %s1975_s27 }
 0x187   : > { %817 = vrot.lane.b32.xlu2 %v681_v15, %s1975_s27 }
 0x18e   : > { %863 = vrot.lane.b32.xlu1 %v680_v17, %s1976_s28  ;;  %861 = vrot.lane.b32.xlu0 %v679_v16, %s1976_s28 }
 0x18f   : > { %865 = vrot.lane.b32.xlu2 %v681_v15, %s1976_s28 }
 0x196   : > { %911 = vrot.lane.b32.xlu1 %v680_v17, %s1977_s29  ;;  %909 = vrot.lane.b32.xlu0 %v679_v16, %s1977_s29 }
 0x197   : > { %913 = vrot.lane.b32.xlu2 %v681_v15, %s1977_s29 }
 0x19e   : > { %959 = vrot.lane.b32.xlu1 %v680_v17, %s1978_s23  ;;  %957 = vrot.lane.b32.xlu0 %v679_v16, %s1978_s23 }
 0x19f   : > { %961 = vrot.lane.b32.xlu2 %v681_v15, %s1978_s23 }
 0x1a6   : > { %1007 = vrot.lane.b32.xlu1 %v680_v17, %s1979_s7  ;;  %1005 = vrot.lane.b32.xlu0 %v679_v16, %s1979_s7 }
 0x1a7   : > { %1009 = vrot.lane.b32.xlu2 %v681_v15, %s1979_s7 }
 0x1ae   : > { %1055 = vrot.lane.b32.xlu1 %v680_v17, %s1980_s5  ;;  %1053 = vrot.lane.b32.xlu0 %v679_v16, %s1980_s5 }
 0x1af   : > { %1057 = vrot.lane.b32.xlu2 %v681_v15, %s1980_s5  ;;  %v1726_v15 = vld [vmem:[%s2098_s22 + $0x1c] sm:$0xf] }
 0x1b6   : > { %1101 = vperm.xlu0 %1866, %v2104_v2  }
 0x1d1   : > { %v768_v21 = vpop.permute.xlu2 %767 }
 0x1d9   : > { %v770_v22 = vpop.permute.xlu2 %769 }
 0x1da   : > { %v773_v26 = vsel %vm771_vm12, %v768_v21, %v770_v22 }
 0x1db   : > { %v781_v32 = vsel %vm695_vm10, %v773_v26, 0 }
 0x1e1   : > { %v818_v25 = vpop.permute.xlu2 %817 }
 0x1e8   : > { %v687_v23 = vpop.permute.xlu1 %686  ;;  %v683_v24 = vpop.permute.xlu0 %682 }
 0x1e9   : > { %v866_v37 = vpop.permute.xlu2 %865 }
 0x1f0   : > { %v766_v27 = vpop.permute.xlu1 %765  ;;  %v685_v28 = vpop.permute.xlu0 %684 }
 0x1f1   : > { %v689_v29 = vsel %vm688_vm13, %v683_v24, %v685_v28  ;;  %v690_v30 = vsel %vm688_vm13, %v685_v28, %v687_v23  ;;  %v772_v31 = vsel %vm771_vm12, %v766_v27, %v768_v21  ;;  %v914_v51 = vpop.permute.xlu2 %913  ;;  %v1723_v23 = vld [vmem:[%s2098_s22 + $0x18] sm:$0xf]  ;;  %v1729_v24 = vld [vmem:[%s2098_s22 + $0x20] sm:$0xf] }
 0x1f2   : > { %v697_v33 = vsel %vm695_vm10, %v689_v29, 0  ;;  %v700_v34 = vsel %vm695_vm10, %v690_v30, 0  ;;  %v778_v35 = vsel %vm695_vm10, %v772_v31, 0 }
 0x1f3   : > { %709 = vmatpush.bf16.msra.mxu0 %v697_v33  ;;  %722 = vmatpush.bf16.msra.mxu1 %v700_v34 }
 0x1f6   : > { %1707 = vmatmul.msk.bf16.vlgmr.msra.gmra.mxu0 %vm691_vm11, %v1706_v36  ;;  %1708 = vmatmul.msk.bf16.vlgmr.msra.gmra.mxu1 %vm691_vm11, %v1706_v36 }
 0x1f7   : > { %790 = vmatpush.bf16.msrb.mxu0 %v778_v35  ;;  %803 = vmatpush.bf16.msrb.mxu1 %v781_v32 }
 0x1f8   : > { %v816_v38 = vpop.permute.xlu1 %815  ;;  %v814_v39 = vpop.permute.xlu0 %813 }
 0x1f9   : > { %v820_v40 = vsel %vm819_vm14, %v814_v39, %v816_v38  ;;  %v821_v41 = vsel %vm819_vm14, %v816_v38, %v818_v25  ;;  %v962_v60 = vpop.permute.xlu2 %961 }
 0x1fa   : > { %v826_v42 = vsel %vm695_vm10, %v820_v40, 0  ;;  %v829_v43 = vsel %vm695_vm10, %v821_v41, 0 }
 0x1fb   : > { %838 = vmatpush.bf16.msrb.mxu2 %v826_v42  ;;  %851 = vmatpush.bf16.msrb.mxu3 %v829_v43 }
 0x1fd   : > { %v746_v25 = vpop.f32.mrf.mxu2 }
 0x1fe   : > { %1715 = vmatmul.msk.bf16.vlgmr.msrb.gmra.mxu2 %vm691_vm11, %v1714_v44  ;;  %1716 = vmatmul.msk.bf16.vlgmr.msrb.gmra.mxu3 %vm691_vm11, %v1714_v44  ;;  %v759_v26 = vpop.f32.mrf.mxu3 }
 0x200   : > { %v864_v45 = vpop.permute.xlu1 %863  ;;  %v862_v46 = vpop.permute.xlu0 %861 }
 0x201   : > { %v869_v47 = vsel %vm867_vm15, %v864_v45, %v866_v37  ;;  %v868_v48 = vsel %vm867_vm15, %v862_v46, %v864_v45  ;;  %v1010_v7 = vpop.permute.xlu2 %1009 }
 0x202   : > { %v877_v49 = vsel %vm695_vm10, %v869_v47, 0  ;;  %v874_v50 = vsel %vm695_vm10, %v868_v48, 0 }
 0x203   : > { %886 = vmatpush.bf16.msra.mxu0 %v874_v50  ;;  %899 = vmatpush.bf16.msra.mxu1 %v877_v49 }
 0x205   : > { %v748_v27 = vpop.f32.mrf.mxu2 }
 0x206   : > { %1712 = vmatmul.msk.bf16.vlgmr.msrb.gmra.mxu0 %vm691_vm11, %v1711_v52  ;;  %1713 = vmatmul.msk.bf16.vlgmr.msrb.gmra.mxu1 %vm691_vm11, %v1711_v52  ;;  %v761_v28 = vpop.f32.mrf.mxu3 }
 0x208   : > { %v912_v53 = vpop.permute.xlu1 %911  ;;  %v910_v54 = vpop.permute.xlu0 %909 }
 0x209   : > { %v917_v55 = vsel %vm915_vm0, %v912_v53, %v914_v51  ;;  %v916_v56 = vsel %vm915_vm0, %v910_v54, %v912_v53  ;;  %v1058_v16 = vpop.permute.xlu2 %1057 }
 0x20a   : > { %v925_v57 = vsel %vm695_vm10, %v917_v55, 0  ;;  %v922_v58 = vsel %vm695_vm10, %v916_v56, 0 }
 0x20b   : > { %934 = vmatpush.bf16.msra.mxu2 %v922_v58  ;;  %947 = vmatpush.bf16.msra.mxu3 %v925_v57 }
 0x20e   : > { %1721 = vmatmul.msk.bf16.vlgmr.msra.gmra.mxu2 %vm691_vm11, %v1720_v59  ;;  %1722 = vmatmul.msk.bf16.vlgmr.msra.gmra.mxu3 %vm691_vm11, %v1720_v59 }
 0x210   : > { %v960_v61 = vpop.permute.xlu1 %959  ;;  %v958_v62 = vpop.permute.xlu0 %957 }
 0x211   : > { %v965_v63 = vsel %vm963_vm1, %v960_v61, %v962_v60  ;;  %v964_v3 = vsel %vm963_vm1, %v958_v62, %v960_v61 }
 0x212   : > { %v973_v4 = vsel %vm695_vm10, %v965_v63, 0  ;;  %v970_v5 = vsel %vm695_vm10, %v964_v3, 0 }
 0x213   : > { %982 = vmatpush.bf16.msrb.mxu0 %v970_v5  ;;  %995 = vmatpush.bf16.msrb.mxu1 %v973_v4 }
 0x216   : > { %1718 = vmatmul.msk.bf16.vlgmr.msra.gmra.mxu0 %vm691_vm11, %v1717_v6  ;;  %1719 = vmatmul.msk.bf16.vlgmr.msra.gmra.mxu1 %vm691_vm11, %v1717_v6 }
 0x218   : > { %v1008_v9 = vpop.permute.xlu1 %1007  ;;  %v1006_v10 = vpop.permute.xlu0 %1005 }
 0x219   : > { %v1013_v11 = vsel %vm1011_vm2, %v1008_v9, %v1010_v7  ;;  %v1012_v12 = vsel %vm1011_vm2, %v1006_v10, %v1008_v9 }
 0x21a   : > { %v1021_v13 = vsel %vm695_vm10, %v1013_v11, 0  ;;  %v1018_v14 = vsel %vm695_vm10, %v1012_v12, 0 }
 0x21b   : > { %1030 = vmatpush.bf16.msrb.mxu2 %v1018_v14  ;;  %1043 = vmatpush.bf16.msrb.mxu3 %v1021_v13 }
 0x21e   : > { %1727 = vmatmul.msk.bf16.vlgmr.msrb.gmra.mxu2 %vm691_vm11, %v1726_v15  ;;  %1728 = vmatmul.msk.bf16.vlgmr.msrb.gmra.mxu3 %vm691_vm11, %v1726_v15 }
 0x220   : > { %v1056_v17 = vpop.permute.xlu1 %1055  ;;  %v1054_v18 = vpop.permute.xlu0 %1053 }
 0x221   : > { %v1061_v19 = vsel %vm1059_vm3, %v1056_v17, %v1058_v16  ;;  %v1060_v20 = vsel %vm1059_vm3, %v1054_v18, %v1056_v17 }
 0x222   : > { %v1069_v21 = vsel %vm695_vm10, %v1061_v19, 0  ;;  %v1066_v22 = vsel %vm695_vm10, %v1060_v20, 0 }
 0x223   : > { %1078 = vmatpush.bf16.msra.mxu0 %v1066_v22  ;;  %1091 = vmatpush.bf16.msra.mxu1 %v1069_v21 }
 0x226   : > { %1724 = vmatmul.msk.bf16.vlgmr.msrb.gmra.mxu0 %vm691_vm11, %v1723_v23  ;;  %1725 = vmatmul.msk.bf16.vlgmr.msrb.gmra.mxu1 %vm691_vm11, %v1723_v23 }
 0x228   : > { %v1102_v10 = vpop.permute.xlu0 %1101 }
 0x236   : > { %1730 = vmatmul.msk.bf16.vlgmr.msra.gmra.mxu0 %vm691_vm11, %v1729_v24  ;;  %1731 = vmatmul.msk.bf16.vlgmr.msra.gmra.mxu1 %vm691_vm11, %v1729_v24 }
 0x273   : > { %v711_v29 = vpop.f32.mrf.mxu0  ;;  %v724_v30 = vpop.f32.mrf.mxu1 }
 0x274   : > { %v747_v49 = vadd.f32 %v746_v25, %v711_v29  ;;  %v760_v50 = vadd.f32 %v759_v26, %v724_v30 }
 0x27b   : > { %v713_v31 = vpop.f32.mrf.mxu0  ;;  %v726_v32 = vpop.f32.mrf.mxu1 }
 0x281   : > { %v840_v33 = vpop.f32.mrf.mxu2  ;;  %v853_v34 = vpop.f32.mrf.mxu3 }
 0x283   : > { %v792_v35 = vpop.f32.mrf.mxu0  ;;  %v805_v36 = vpop.f32.mrf.mxu1 }
 0x284   : > { %v809_v53 = vadd.f32 %v792_v35, %v747_v49  ;;  %v810_v54 = vadd.f32 %v805_v36, %v760_v50 }
 0x286   : > { %v857_v57 = vadd.f32 %v840_v33, %v809_v53  ;;  %v858_v58 = vadd.f32 %v853_v34, %v810_v54 }
 0x289   : > { %v842_v37 = vpop.f32.mrf.mxu2  ;;  %v855_v38 = vpop.f32.mrf.mxu3 }
 0x28b   : > { %v794_v39 = vpop.f32.mrf.mxu0  ;;  %v807_v40 = vpop.f32.mrf.mxu1 }
 0x291   : > { %v936_v41 = vpop.f32.mrf.mxu2  ;;  %v949_v42 = vpop.f32.mrf.mxu3 }
 0x293   : > { %v888_v43 = vpop.f32.mrf.mxu0  ;;  %v901_v44 = vpop.f32.mrf.mxu1 }
 0x294   : > { %v905_v59 = vadd.f32 %v888_v43, %v857_v57  ;;  %v906_v60 = vadd.f32 %v901_v44, %v858_v58 }
 0x296   : > { %v953_v4 = vadd.f32 %v936_v41, %v905_v59  ;;  %v954_v5 = vadd.f32 %v949_v42, %v906_v60 }
 0x299   : > { %v938_v45 = vpop.f32.mrf.mxu2  ;;  %v951_v46 = vpop.f32.mrf.mxu3 }
 0x29b   : > { %v890_v47 = vpop.f32.mrf.mxu0  ;;  %v903_v48 = vpop.f32.mrf.mxu1 }
 0x2a1   : > { %v1032_v51 = vpop.f32.mrf.mxu2  ;;  %v1045_v52 = vpop.f32.mrf.mxu3 }
 0x2a3   : > { %v984_v55 = vpop.f32.mrf.mxu0  ;;  %v997_v56 = vpop.f32.mrf.mxu1 }
 0x2a4   : > { %v1001_v6 = vadd.f32 %v984_v55, %v953_v4  ;;  %v1002_v7 = vadd.f32 %v997_v56, %v954_v5 }
 0x2a6   : > { %v1049_v8 = vadd.f32 %v1032_v51, %v1001_v6  ;;  %v1050_v9 = vadd.f32 %v1045_v52, %v1002_v7 }
 0x2a9   : > { %v1034_v61 = vpop.f32.mrf.mxu2  ;;  %v1047_v62 = vpop.f32.mrf.mxu3 }
 0x2ab   : > { %v986_v63 = vpop.f32.mrf.mxu0  ;;  %v999_v3 = vpop.f32.mrf.mxu1 }
 0x2b3   : > { %v1080_v11 = vpop.f32.mrf.mxu0  ;;  %v1093_v12 = vpop.f32.mrf.mxu1 }
 0x2b4   : > { %v1097_v13 = vadd.f32 %v1080_v11, %v1049_v8  ;;  %v1098_v14 = vadd.f32 %v1093_v12, %v1050_v9 }
 0x2b6   : > { %v1104_v15 = vadd.f32 %v1102_v10, %v1097_v13  ;;  %v1105_v16 = vadd.f32 %v1102_v10, %v1098_v14 }
 0x2b8   : > { %v1106_v17 = vmax.f32 %v1104_v15, 0.0  ;;  %v1107_v18 = vmax.f32 %v1105_v16, 0.0 }
 0x2ba   : > { %1108 = vst [vmem:[%s2106_s6] sm:$0xff] %v1106_v17 }
 0x2bb   : > { %1109 = vst [vmem:[%s2106_s6 + $0x8] sm:$0xff] %v1107_v18  ;;  %v1082_v19 = vpop.f32.mrf.mxu0  ;;  %v1095_v20 = vpop.f32.mrf.mxu1 }
 0x2bc PF: > { %p1732_p2 = scmp.ne.s32.totalorder %s1946_s15, 2 }
 0x2bd   : > { %s1982_s8 = smov (!%p1732_p2), 126   ;;  %s1983_s9 = smov (!%p1732_p2), 124  }
 0x2be   : > { %1113 = sbr.rel (%p1732_p2) target bundleno = 1037 (0x40d), region = 44  ;;  %s1984_s10 = smov (!%p1732_p2), 112  }
 0x2bf   : > { %s1985_s11 = smov (!%p1732_p2), 110   ;;  %s1986_s20 = smov (!%p1732_p2), 108  }
 0x2c0   : > { %s1987_s21 = smov (!%p1732_p2), 96   ;;  %s1988_s24 = smov (!%p1732_p2), 94  }
 0x2c1   : > { %s1989_s27 = smov (!%p1732_p2), 92  }
 0x2c3   : > { %v1121_v21 = vunpack.c.l.b16 %v2102_v1  ;;  %v1119_v22 = vunpack.c.l.b16 %v2100_v0  ;;  %v1120_v23 = vunpack.c.h.b16 %v2100_v0  ;;  %vm1138_vm4 = vcmask 1043456   ;;  %v1114_v27 = vld [vmem:[%s2098_s22] sm:$0xf]  ;;  %v1733_v43 = vld [vmem:[%s2098_s22 + $0x4] sm:$0xf] }
 0x2c4   : > { %vm1134_vm5 = vcmask 64512   ;;  %vm1214_vm6 = vcmask 1014784   ;;  %vm1131_vm7 = vcmask 1031168   ;;  %vm1262_vm8 = vcmask 916480   ;;  %v1741_v51 = vld [vmem:[%s2098_s22 + $0xc] sm:$0xf] }
 0x2c5   : > { %v1124_v24 = vpack.c.b16 %v1121_v21, %v1121_v21  ;;  %v1122_v25 = vpack.c.b16 %v1119_v22, %v1119_v22  ;;  %v1123_v26 = vpack.c.b16 %v1120_v23, %v1120_v23  ;;  %vm1310_vm9 = vcmask 900096   ;;  %v1738_v59 = vld [vmem:[%s2098_s22 + $0x8] sm:$0xf]  ;;  %v1747_v5 = vld [vmem:[%s2098_s22 + $0x14] sm:$0xf] }
 0x2c6   : > { %vm1358_vm10 = vcmask 883712   ;;  %vm1406_vm11 = vcmask 785408   ;;  %v1744_v13 = vld [vmem:[%s2098_s22 + $0x10] sm:$0xf]  ;;  %vm1454_vm12 = vcmask 769024   ;;  %v1990_v15 = vmov 0  }
 0x2c7   : > { %1129 = vrot.lane.b32.xlu1 %v1124_v24, %s1982_s8  ;;  %1125 = vrot.lane.b32.xlu0 %v1122_v25, %s1982_s8  ;;  %v1175_v0 = vsel %vm1138_vm4, %v1122_v25, 0  ;;  %v1178_v1 = vsel %vm1138_vm4, %v1123_v26, 0  ;;  %v1753_v22 = vld [vmem:[%s2098_s22 + $0x1c] sm:$0xf]  ;;  %vm1502_vm13 = vcmask 752640  }
 0x2c8   : > { %1210 = vrot.lane.b32.xlu2 %v1123_v26, %s1983_s9  ;;  %1187 = vmatpush.bf16.msra.mxu2 %v1175_v0 }
 0x2c9   : > { %1200 = vmatpush.bf16.msra.mxu3 %v1178_v1  ;;  %1867 = vset.pattern.permute.xlu0 %v1990_v15 }
 0x2cb   : > { %1736 = vmatmul.msk.bf16.vlgmr.msra.gmra.mxu2 %vm1134_vm5, %v1114_v27 }
 0x2cc   : > { %1737 = vmatmul.msk.bf16.vlgmr.msra.gmra.mxu3 %vm1134_vm5, %v1114_v27  ;;  %v1750_v27 = vld [vmem:[%s2098_s22 + $0x18] sm:$0xf] }
 0x2cf   : > { %1208 = vrot.lane.b32.xlu1 %v1122_v25, %s1983_s9  ;;  %1127 = vrot.lane.b32.xlu0 %v1123_v26, %s1982_s8 }
 0x2d0   : > { %1212 = vrot.lane.b32.xlu2 %v1124_v24, %s1983_s9 }
 0x2d7   : > { %1258 = vrot.lane.b32.xlu1 %v1123_v26, %s1984_s10  ;;  %1256 = vrot.lane.b32.xlu0 %v1122_v25, %s1984_s10 }
 0x2d8   : > { %1260 = vrot.lane.b32.xlu2 %v1124_v24, %s1984_s10 }
 0x2df   : > { %1306 = vrot.lane.b32.xlu1 %v1123_v26, %s1985_s11  ;;  %1304 = vrot.lane.b32.xlu0 %v1122_v25, %s1985_s11 }
 0x2e0   : > { %1308 = vrot.lane.b32.xlu2 %v1124_v24, %s1985_s11 }
 0x2e7   : > { %1354 = vrot.lane.b32.xlu1 %v1123_v26, %s1986_s20  ;;  %1352 = vrot.lane.b32.xlu0 %v1122_v25, %s1986_s20 }
 0x2e8   : > { %1356 = vrot.lane.b32.xlu2 %v1124_v24, %s1986_s20 }
 0x2ef   : > { %1402 = vrot.lane.b32.xlu1 %v1123_v26, %s1987_s21  ;;  %1400 = vrot.lane.b32.xlu0 %v1122_v25, %s1987_s21 }
 0x2f0   : > { %1404 = vrot.lane.b32.xlu2 %v1124_v24, %s1987_s21 }
 0x2f7   : > { %1450 = vrot.lane.b32.xlu1 %v1123_v26, %s1988_s24  ;;  %1448 = vrot.lane.b32.xlu0 %v1122_v25, %s1988_s24 }
 0x2f8   : > { %1452 = vrot.lane.b32.xlu2 %v1124_v24, %s1988_s24 }
 0x2ff   : > { %1498 = vrot.lane.b32.xlu1 %v1123_v26, %s1989_s27  ;;  %1496 = vrot.lane.b32.xlu0 %v1122_v25, %s1989_s27 }
 0x300   : > { %1500 = vrot.lane.b32.xlu2 %v1124_v24, %s1989_s27 }
 0x307   : > { %1544 = vperm.xlu0 %1867, %v2104_v2  }
 0x322   : > { %v1211_v28 = vpop.permute.xlu2 %1210 }
 0x32a   : > { %v1213_v29 = vpop.permute.xlu2 %1212 }
 0x32b   : > { %v1216_v33 = vsel %vm1214_vm6, %v1211_v28, %v1213_v29 }
 0x32c   : > { %v1224_v39 = vsel %vm1138_vm4, %v1216_v33, 0 }
 0x332   : > { %v1261_v32 = vpop.permute.xlu2 %1260 }
 0x339   : > { %v1130_v30 = vpop.permute.xlu1 %1129  ;;  %v1126_v31 = vpop.permute.xlu0 %1125 }
 0x33a   : > { %v1309_v44 = vpop.permute.xlu2 %1308 }
 0x341   : > { %v1209_v34 = vpop.permute.xlu1 %1208  ;;  %v1128_v35 = vpop.permute.xlu0 %1127 }
 0x342   : > { %v1132_v36 = vsel %vm1131_vm7, %v1126_v31, %v1128_v35  ;;  %v1133_v37 = vsel %vm1131_vm7, %v1128_v35, %v1130_v30  ;;  %v1215_v38 = vsel %vm1214_vm6, %v1209_v34, %v1211_v28  ;;  %v1357_v58 = vpop.permute.xlu2 %1356  ;;  %v1756_v28 = vld [vmem:[%s2098_s22 + $0x20] sm:$0xf] }
 0x343   : > { %v1140_v40 = vsel %vm1138_vm4, %v1132_v36, 0  ;;  %v1143_v41 = vsel %vm1138_vm4, %v1133_v37, 0  ;;  %v1221_v42 = vsel %vm1138_vm4, %v1215_v38, 0 }
 0x344   : > { %1152 = vmatpush.bf16.msra.mxu0 %v1140_v40  ;;  %1165 = vmatpush.bf16.msra.mxu1 %v1143_v41 }
 0x347   : > { %1734 = vmatmul.msk.bf16.vlgmr.msra.gmra.mxu0 %vm1134_vm5, %v1733_v43  ;;  %1735 = vmatmul.msk.bf16.vlgmr.msra.gmra.mxu1 %vm1134_vm5, %v1733_v43 }
 0x348   : > { %1233 = vmatpush.bf16.msrb.mxu0 %v1221_v42  ;;  %1246 = vmatpush.bf16.msrb.mxu1 %v1224_v39 }
 0x349   : > { %v1259_v45 = vpop.permute.xlu1 %1258  ;;  %v1257_v46 = vpop.permute.xlu0 %1256 }
 0x34a   : > { %v1263_v47 = vsel %vm1262_vm8, %v1257_v46, %v1259_v45  ;;  %v1264_v48 = vsel %vm1262_vm8, %v1259_v45, %v1261_v32  ;;  %v1405_v6 = vpop.permute.xlu2 %1404 }
 0x34b   : > { %v1269_v49 = vsel %vm1138_vm4, %v1263_v47, 0  ;;  %v1272_v50 = vsel %vm1138_vm4, %v1264_v48, 0 }
 0x34c   : > { %1281 = vmatpush.bf16.msrb.mxu2 %v1269_v49  ;;  %1294 = vmatpush.bf16.msrb.mxu3 %v1272_v50 }
 0x34e   : > { %v1189_v29 = vpop.f32.mrf.mxu2 }
 0x34f   : > { %1742 = vmatmul.msk.bf16.vlgmr.msrb.gmra.mxu2 %vm1134_vm5, %v1741_v51  ;;  %1743 = vmatmul.msk.bf16.vlgmr.msrb.gmra.mxu3 %vm1134_vm5, %v1741_v51  ;;  %v1202_v30 = vpop.f32.mrf.mxu3 }
 0x351   : > { %v1307_v52 = vpop.permute.xlu1 %1306  ;;  %v1305_v53 = vpop.permute.xlu0 %1304 }
 0x352   : > { %v1312_v54 = vsel %vm1310_vm9, %v1307_v52, %v1309_v44  ;;  %v1311_v55 = vsel %vm1310_vm9, %v1305_v53, %v1307_v52  ;;  %v1453_v14 = vpop.permute.xlu2 %1452 }
 0x353   : > { %v1320_v56 = vsel %vm1138_vm4, %v1312_v54, 0  ;;  %v1317_v57 = vsel %vm1138_vm4, %v1311_v55, 0 }
 0x354   : > { %1329 = vmatpush.bf16.msra.mxu0 %v1317_v57  ;;  %1342 = vmatpush.bf16.msra.mxu1 %v1320_v56 }
 0x356   : > { %v1191_v31 = vpop.f32.mrf.mxu2 }
 0x357   : > { %1739 = vmatmul.msk.bf16.vlgmr.msrb.gmra.mxu0 %vm1134_vm5, %v1738_v59  ;;  %1740 = vmatmul.msk.bf16.vlgmr.msrb.gmra.mxu1 %vm1134_vm5, %v1738_v59  ;;  %v1204_v32 = vpop.f32.mrf.mxu3 }
 0x359   : > { %v1355_v60 = vpop.permute.xlu1 %1354  ;;  %v1353_v61 = vpop.permute.xlu0 %1352 }
 0x35a   : > { %v1360_v62 = vsel %vm1358_vm10, %v1355_v60, %v1357_v58  ;;  %v1359_v63 = vsel %vm1358_vm10, %v1353_v61, %v1355_v60  ;;  %v1501_v23 = vpop.permute.xlu2 %1500 }
 0x35b   : > { %v1368_v3 = vsel %vm1138_vm4, %v1360_v62, 0  ;;  %v1365_v4 = vsel %vm1138_vm4, %v1359_v63, 0 }
 0x35c   : > { %1377 = vmatpush.bf16.msra.mxu2 %v1365_v4  ;;  %1390 = vmatpush.bf16.msra.mxu3 %v1368_v3 }
 0x35f   : > { %1748 = vmatmul.msk.bf16.vlgmr.msra.gmra.mxu2 %vm1134_vm5, %v1747_v5  ;;  %1749 = vmatmul.msk.bf16.vlgmr.msra.gmra.mxu3 %vm1134_vm5, %v1747_v5 }
 0x361   : > { %v1403_v7 = vpop.permute.xlu1 %1402  ;;  %v1401_v8 = vpop.permute.xlu0 %1400 }
 0x362   : > { %v1408_v9 = vsel %vm1406_vm11, %v1403_v7, %v1405_v6  ;;  %v1407_v10 = vsel %vm1406_vm11, %v1401_v8, %v1403_v7 }
 0x363   : > { %v1416_v11 = vsel %vm1138_vm4, %v1408_v9, 0  ;;  %v1413_v12 = vsel %vm1138_vm4, %v1407_v10, 0 }
 0x364   : > { %1425 = vmatpush.bf16.msrb.mxu0 %v1413_v12  ;;  %1438 = vmatpush.bf16.msrb.mxu1 %v1416_v11 }
 0x367   : > { %1745 = vmatmul.msk.bf16.vlgmr.msra.gmra.mxu0 %vm1134_vm5, %v1744_v13  ;;  %1746 = vmatmul.msk.bf16.vlgmr.msra.gmra.mxu1 %vm1134_vm5, %v1744_v13 }
 0x369   : > { %v1451_v16 = vpop.permute.xlu1 %1450  ;;  %v1449_v17 = vpop.permute.xlu0 %1448 }
 0x36a   : > { %v1456_v18 = vsel %vm1454_vm12, %v1451_v16, %v1453_v14  ;;  %v1455_v19 = vsel %vm1454_vm12, %v1449_v17, %v1451_v16 }
 0x36b   : > { %v1464_v20 = vsel %vm1138_vm4, %v1456_v18, 0  ;;  %v1461_v21 = vsel %vm1138_vm4, %v1455_v19, 0 }
 0x36c   : > { %1473 = vmatpush.bf16.msrb.mxu2 %v1461_v21  ;;  %1486 = vmatpush.bf16.msrb.mxu3 %v1464_v20 }
 0x36f   : > { %1754 = vmatmul.msk.bf16.vlgmr.msrb.gmra.mxu2 %vm1134_vm5, %v1753_v22  ;;  %1755 = vmatmul.msk.bf16.vlgmr.msrb.gmra.mxu3 %vm1134_vm5, %v1753_v22 }
 0x371   : > { %v1499_v24 = vpop.permute.xlu1 %1498  ;;  %v1497_v25 = vpop.permute.xlu0 %1496 }
 0x372   : > { %v1504_v2 = vsel %vm1502_vm13, %v1499_v24, %v1501_v23  ;;  %v1503_v26 = vsel %vm1502_vm13, %v1497_v25, %v1499_v24 }
 0x373   : > { %v1512_v0 = vsel %vm1138_vm4, %v1504_v2, 0  ;;  %v1509_v1 = vsel %vm1138_vm4, %v1503_v26, 0 }
 0x374   : > { %1521 = vmatpush.bf16.msra.mxu0 %v1509_v1  ;;  %1534 = vmatpush.bf16.msra.mxu1 %v1512_v0 }
 0x377   : > { %1751 = vmatmul.msk.bf16.vlgmr.msrb.gmra.mxu0 %vm1134_vm5, %v1750_v27  ;;  %1752 = vmatmul.msk.bf16.vlgmr.msrb.gmra.mxu1 %vm1134_vm5, %v1750_v27 }
 0x379   : > { %v1545_v14 = vpop.permute.xlu0 %1544 }
 0x387   : > { %1757 = vmatmul.msk.bf16.vlgmr.msra.gmra.mxu0 %vm1134_vm5, %v1756_v28  ;;  %1758 = vmatmul.msk.bf16.vlgmr.msra.gmra.mxu1 %vm1134_vm5, %v1756_v28 }
 0x3c4   : > { %v1154_v33 = vpop.f32.mrf.mxu0  ;;  %v1167_v34 = vpop.f32.mrf.mxu1 }
 0x3c5   : > { %v1190_v53 = vadd.f32 %v1189_v29, %v1154_v33  ;;  %v1203_v54 = vadd.f32 %v1202_v30, %v1167_v34 }
 0x3cc   : > { %v1156_v35 = vpop.f32.mrf.mxu0  ;;  %v1169_v36 = vpop.f32.mrf.mxu1 }
 0x3d2   : > { %v1283_v37 = vpop.f32.mrf.mxu2  ;;  %v1296_v38 = vpop.f32.mrf.mxu3 }
 0x3d4   : > { %v1235_v39 = vpop.f32.mrf.mxu0  ;;  %v1248_v40 = vpop.f32.mrf.mxu1 }
 0x3d5   : > { %v1252_v57 = vadd.f32 %v1235_v39, %v1190_v53  ;;  %v1253_v58 = vadd.f32 %v1248_v40, %v1203_v54 }
 0x3d7   : > { %v1300_v61 = vadd.f32 %v1283_v37, %v1252_v57  ;;  %v1301_v62 = vadd.f32 %v1296_v38, %v1253_v58 }
 0x3da   : > { %v1285_v41 = vpop.f32.mrf.mxu2  ;;  %v1298_v42 = vpop.f32.mrf.mxu3 }
 0x3dc   : > { %v1237_v43 = vpop.f32.mrf.mxu0  ;;  %v1250_v44 = vpop.f32.mrf.mxu1 }
 0x3e2   : > { %v1379_v45 = vpop.f32.mrf.mxu2  ;;  %v1392_v46 = vpop.f32.mrf.mxu3 }
 0x3e4   : > { %v1331_v47 = vpop.f32.mrf.mxu0  ;;  %v1344_v48 = vpop.f32.mrf.mxu1 }
 0x3e5   : > { %v1348_v63 = vadd.f32 %v1331_v47, %v1300_v61  ;;  %v1349_v3 = vadd.f32 %v1344_v48, %v1301_v62 }
 0x3e7   : > { %v1396_v8 = vadd.f32 %v1379_v45, %v1348_v63  ;;  %v1397_v9 = vadd.f32 %v1392_v46, %v1349_v3 }
 0x3ea   : > { %v1381_v49 = vpop.f32.mrf.mxu2  ;;  %v1394_v50 = vpop.f32.mrf.mxu3 }
 0x3ec   : > { %v1333_v51 = vpop.f32.mrf.mxu0  ;;  %v1346_v52 = vpop.f32.mrf.mxu1 }
 0x3f2   : > { %v1475_v55 = vpop.f32.mrf.mxu2  ;;  %v1488_v56 = vpop.f32.mrf.mxu3 }
 0x3f4   : > { %v1427_v59 = vpop.f32.mrf.mxu0  ;;  %v1440_v60 = vpop.f32.mrf.mxu1 }
 0x3f5   : > { %v1444_v10 = vadd.f32 %v1427_v59, %v1396_v8  ;;  %v1445_v11 = vadd.f32 %v1440_v60, %v1397_v9 }
 0x3f7   : > { %v1492_v12 = vadd.f32 %v1475_v55, %v1444_v10  ;;  %v1493_v13 = vadd.f32 %v1488_v56, %v1445_v11 }
 0x3fa   : > { %v1477_v4 = vpop.f32.mrf.mxu2  ;;  %v1490_v5 = vpop.f32.mrf.mxu3 }
 0x3fc   : > { %v1429_v6 = vpop.f32.mrf.mxu0  ;;  %v1442_v7 = vpop.f32.mrf.mxu1 }
 0x404   : > { %v1523_v15 = vpop.f32.mrf.mxu0  ;;  %v1536_v16 = vpop.f32.mrf.mxu1 }
 0x405   : > { %v1540_v17 = vadd.f32 %v1523_v15, %v1492_v12  ;;  %v1541_v18 = vadd.f32 %v1536_v16, %v1493_v13 }
 0x407   : > { %v1547_v19 = vadd.f32 %v1545_v14, %v1540_v17  ;;  %v1548_v20 = vadd.f32 %v1545_v14, %v1541_v18 }
 0x409   : > { %v1549_v21 = vmax.f32 %v1547_v19, 0.0  ;;  %v1550_v22 = vmax.f32 %v1548_v20, 0.0 }
 0x40b   : > { %1551 = vst [vmem:[%s2106_s6] sm:$0xff] %v1549_v21 }
 0x40c   : > { %1552 = vst [vmem:[%s2106_s6 + $0x8] sm:$0xff] %v1550_v22  ;;  %v1525_v23 = vpop.f32.mrf.mxu0  ;;  %v1538_v24 = vpop.f32.mrf.mxu1 }
 0x40d PF: > { %s1760_s22 = sshll.u32 %s1946_s15, 1  ;;  %s1766_s28 = smul.u32 6, %s1950_s16 }
 0x40e   : > { %s1569_s29 = sshll.u32 %s2106_s6, 4  ;;  %s1554_s11 = scalar_lea.sflag [#allocation3], %s203_s4  ;;  %s1570_s29 = int_to_ptr.vmem [resolvable:$true] %s1569_s29 }
 0x40f   : > { %s1565_s23 = sadd.s32 %s1766_s28, %s1760_s22  ;;  %s1888_s6 = scalar_lea.hbm %s2313_s3, 96 }
 0x410   : > { %s1761_s7 = sshll.u32 %s1565_s23, 3 }
 0x411   : > { %s1567_s9 = scalar_lea.hbm %s2313_s3, %s1761_s7 }
 0x412   : > { %s1571_s10 = sshll.u32 %s1567_s9, 4  ;;  %s1572_s10 = int_to_ptr.hbm [resolvable:$true] %s1571_s10 }
 0x413   : > { %s1882_s20 = sshra.s32 %s1572_s10, 4  ;;  %s1883_s20 = int_to_ptr.hbm [resolvable:$true] %s1882_s20 }
 0x414   : > { %s1884_s21 = scalar_lea.hbm %s1883_s20, 16  ;;  %p1889_p7 = scmp.lt.s32.totalorder %s1883_s20, %s2313_s3 }
 0x415   : > { %p1885_p4 = scmp.ne.s32.totalorder %s1883_s20, %s1884_s21  ;;  %p1890_p9 = scmp.lt.s32.totalorder %s1888_s6, %s1884_s21 }
 0x417   : > { %p1886_p5 = pnand %p1885_p4, %p2062_p3  ;;  %p1891_p10 = por %p1890_p9, %p1889_p7 }
 0x419   : > { %p1887_p6 = pneg %p1886_p5 }
 0x41b   : > { %p1892_p11 = pnand %p1891_p10, %p1887_p6 }
 0x41d   : > { %1895 = shalt.err (!%p1892_p11)
}
 0x41e   : > { %1767 = dma.vmem_to_hbm [thread:$0]  (%p2062_p3), %s1570_s29, 256, %s1572_s10, %s1554_s11  }
 0x41f PF: > { %p1773_p12 = scmp.ge.s32.totalorder %s1962_s19, 2  ;;  %s1583_s4 = sand.u32 1, %s1934_s12  }
 0x420   : > { %s1584_s22 = scalar_lea.sflag [#allocation3], %s1583_s4 }
 0x421   : > { %p1770_p13 = pnand %p1773_p12, %p2071_p8 }
 0x423   : > { %p1771_p0 = pneg %p1770_p13 }
 0x425   : > { %1929 = dma.done.wait (%p1771_p0), %s1584_s22, 256  }
 0x426   : > { %1931 = vsyncadd (%p1771_p0), %s1584_s22, 4294967040  ;;  %s16_s19 = sadd.s32 1, %s1962_s19   ;;  %s2320_s25 = sld [smem:[#allocation5_spill]] }
 0x427   : > { %p13_p1 = scmp.ge.s32.totalorder %s16_s19, 8   ;;  %s2321_s28 = sld [smem:[#allocation6_spill]] }
 0x428   : > { %s2322_s12 = smov %s1938_s13  ;;  %s2323_s13 = smov %s1942_s14 }
 0x429   : > { %s2324_s14 = smov %s2080_s30  ;;  %s2325_s15 = smov %s1954_s17 }
 0x42a   : > { %s2326_s16 = smov %s1958_s18  ;;  %15 = sbr.rel (!%p13_p1) target bundleno = 5 (0x5), region = 109 }
 0x42c   : > { %s2327_s17 = smov %s2320_s25 }
 0x42d   : > { %s2328_s18 = smov %s2321_s28 }
 0x42f   :  { %1590 = vsyncpa [#allocation3], 1 }
 0x430   :  { %1592 = vsyncpa [#allocation3 + $0x1], 1 }

</bundles_post_ra>
